<compile_context>
chip_gen: v7x
topology: tpu7x:2x2x1
jax: 0.10.0
libtpu: 0.0.40
codegen_flags: <defaults>
</compile_context>

<pallas_src>
import jax
import jax.numpy as jnp
from jax.experimental import pallas as pl
from jax.experimental.pallas import tpu as pltpu

LRELU_SLOPE = 0.2
BN_EPS = 1e-5

VMEM_LIMIT_BYTES = 48 * 1024 * 1024   # explicit scoped limit; < v7x 64 MiB physical
VMEM_BUDGET = 40 * 1024 * 1024        # tile-planning budget (double-buffered)

# Per-layer config matching D.forward:
#   conv1          -> LeakyReLU fused as epilogue
#   conv2..conv5   -> BN (train-mode batch stats) + LeakyReLU
#   conv6          -> sigmoid (plain JAX, Cout == 1)
LAYER_DO_BN = [False, True, True, True, True, False]
LAYER_STRIDES = [2, 2, 2, 1, 1, 1]


def _round_up(x, m):
    return (x + m - 1) // m * m


# ---------------------------------------------------------------------------
# Matmul kernels (conv-as-matmul).  epilogue in {"none", "lrelu"}.
# ---------------------------------------------------------------------------
def _make_single_pass_kernel(epilogue, do_stats, tm, m_actual, need_mask):
    """n_k == 1: one MXU pass per (M, N) tile; no acc scratch, no pl.when."""

    def kernel(p_ref, w_ref, b_ref, *outs):
        if do_stats:
            y_ref, stats_ref = outs
        else:
            (y_ref,) = outs
        y = jnp.dot(p_ref[...], w_ref[...], preferred_element_type=jnp.float32)
        y = y + b_ref[...]
        if do_stats:
            ym = y
            if need_mask:
                # pl.program_id only at kernel top level (lowering-safe).
                row0 = pl.program_id(0) * tm
                rid = jax.lax.broadcasted_iota(jnp.int32, (tm, 1), 0) + row0
                ym = y * (rid < m_actual).astype(jnp.float32)
            s = jnp.sum(ym, axis=0, keepdims=True)
            q = jnp.sum(ym * ym, axis=0, keepdims=True)
            stats_ref[0] = jnp.concatenate([s, q], axis=0)
        if epilogue == "lrelu":
            y = jnp.where(y >= 0, y, LRELU_SLOPE * y)
        y_ref[...] = y.astype(y_ref.dtype)

    return kernel


def _make_multi_k_kernel(epilogue, do_stats, tm, m_actual, need_mask):
    """n_k > 1: accumulate over K tiles in an f32 VMEM scratch."""

    def kernel(p_ref, w_ref, b_ref, *rest):
        if do_stats:
            y_ref, stats_ref, acc_ref = rest
        else:
            y_ref, acc_ref = rest
        # All grid queries + mask construction at the kernel top level; the
        # pl.when bodies below only capture already-computed values.
        k = pl.program_id(2)
        k_last = pl.num_programs(2) - 1
        if do_stats and need_mask:
            row0 = pl.program_id(0) * tm
            rid = jax.lax.broadcasted_iota(jnp.int32, (tm, 1), 0) + row0
            valid = (rid < m_actual).astype(jnp.float32)

        @pl.when(k == 0)
        def _():
            acc_ref[...] = jnp.zeros_like(acc_ref)

        acc_ref[...] += jnp.dot(p_ref[...], w_ref[...],
                                preferred_element_type=jnp.float32)

        @pl.when(k == k_last)
        def _():
            y = acc_ref[...] + b_ref[...]
            if do_stats:
                ym = y * valid if need_mask else y
                s = jnp.sum(ym, axis=0, keepdims=True)
                q = jnp.sum(ym * ym, axis=0, keepdims=True)
                stats_ref[0] = jnp.concatenate([s, q], axis=0)
            yy = jnp.where(y >= 0, y, LRELU_SLOPE * y) if epilogue == "lrelu" else y
            y_ref[...] = yy.astype(y_ref.dtype)

    return kernel


def _plan_tiles(M, K_pad, CN, out_itemsize):
    """Pick (TM, M_pad, TN, TK) within the double-buffered VMEM budget."""
    if M >= 512:
        TM = 512
    elif M >= 256:
        TM = 256
    else:
        TM = _round_up(max(M, 16), 16)   # bf16-friendly sublane alignment
    M_pad = _round_up(M, TM)

    if CN <= 256:
        TN = CN
    elif CN % 256 == 0:
        TN = 256
    else:
        TN = 128

    def fits(tk):
        b = 2 * (TM * tk + tk * TN) * 2        # double-buffered bf16 operands
        b += 2 * TM * TN * out_itemsize        # double-buffered output block
        b += TM * TN * 4                       # f32 accumulator scratch
        b += 64 * TN * 4                       # bias + stats blocks (slack)
        return b <= VMEM_BUDGET

    if fits(K_pad):
        TK = K_pad                             # whole K resident -> n_k == 1
    else:
        TK = 128
        cand = 2048
        while cand >= 128:
            if K_pad % cand == 0 and fits(cand):
                TK = cand
                break
            cand //= 2
    return TM, M_pad, TN, TK


def _conv_layer(patches, w_pad, b_pad, *, epilogue, do_stats, out_dtype):
    """Tiled MXU matmul for one conv layer.

    patches: (M, K_pad) bf16; w_pad: (K_pad, CN) bf16; b_pad: (1, CN) f32.
    Returns (y_pad (M_pad, CN) out_dtype, stats (n_m, 2, CN) f32 or None).
    """
    M, K_pad = patches.shape
    _, CN = w_pad.shape
    TM, M_pad, TN, TK = _plan_tiles(M, K_pad, CN, jnp.dtype(out_dtype).itemsize)
    if M_pad != M:
        patches = jnp.pad(patches, ((0, M_pad - M), (0, 0)))
    n_m, n_n, n_k = M_pad // TM, CN // TN, K_pad // TK
    need_mask = M_pad != M

    if n_k == 1:
        kernel = _make_single_pass_kernel(epilogue, do_stats, TM, M, need_mask)
        grid = (n_m, n_n)
        in_specs = [pl.BlockSpec((TM, K_pad), lambda i, j: (i, 0)),
                    pl.BlockSpec((K_pad, TN), lambda i, j: (0, j)),
                    pl.BlockSpec((1, TN), lambda i, j: (0, j))]
        y_spec = pl.BlockSpec((TM, TN), lambda i, j: (i, j))
        st_spec = pl.BlockSpec((1, 2, TN), lambda i, j: (i, 0, j))
        scratch = []
        dims = ("parallel", "parallel")
    else:
        kernel = _make_multi_k_kernel(epilogue, do_stats, TM, M, need_mask)
        grid = (n_m, n_n, n_k)
        in_specs = [pl.BlockSpec((TM, TK), lambda i, j, k: (i, k)),
                    pl.BlockSpec((TK, TN), lambda i, j, k: (k, j)),
                    pl.BlockSpec((1, TN), lambda i, j, k: (0, j))]
        y_spec = pl.BlockSpec((TM, TN), lambda i, j, k: (i, j))
        st_spec = pl.BlockSpec((1, 2, TN), lambda i, j, k: (i, 0, j))
        scratch = [pltpu.VMEM((TM, TN), jnp.float32)]
        dims = ("parallel", "parallel", "arbitrary")

    if do_stats:
        out_shape = (jax.ShapeDtypeStruct((M_pad, CN), out_dtype),
                     jax.ShapeDtypeStruct((n_m, 2, CN), jnp.float32))
        out_specs = (y_spec, st_spec)
    else:
        out_shape = jax.ShapeDtypeStruct((M_pad, CN), out_dtype)
        out_specs = y_spec

    res = pl.pallas_call(
        kernel,
        out_shape=out_shape,
        grid_spec=pltpu.PrefetchScalarGridSpec(
            num_scalar_prefetch=0,
            grid=grid,
            in_specs=in_specs,
            out_specs=out_specs,
            scratch_shapes=scratch),
        compiler_params=pltpu.CompilerParams(
            dimension_semantics=dims,
            vmem_limit_bytes=VMEM_LIMIT_BYTES),
    )(patches, w_pad, b_pad)

    if do_stats:
        return res[0], res[1]
    return res, None


# ---------------------------------------------------------------------------
# BatchNorm apply + LeakyReLU: pure streaming pass, bf16 in / bf16 out.
# ---------------------------------------------------------------------------
def _bn_apply_kernel(y_ref, ss_ref, o_ref):
    a = y_ref[...].astype(jnp.float32) * ss_ref[0:1, :] + ss_ref[1:2, :]
    o_ref[...] = jnp.where(a >= 0, a, LRELU_SLOPE * a).astype(o_ref.dtype)


def _bn_apply(y_pad, scale, shift, out_dtype):
    M_pad, CN = y_pad.shape
    # Largest row block dividing M_pad (multiple of 16) under a small budget.
    budget = 8 * 1024 * 1024
    br = M_pad
    while br > 16 and 2 * br * CN * (y_pad.dtype.itemsize +
                                     jnp.dtype(out_dtype).itemsize) > budget:
        half = br // 2
        if half % 16 == 0 and M_pad % half == 0:
            br = half
        else:
            break
    ss = jnp.stack([scale, shift], axis=0).astype(jnp.float32)   # (2, CN)
    return pl.pallas_call(
        _bn_apply_kernel,
        out_shape=jax.ShapeDtypeStruct((M_pad, CN), out_dtype),
        grid_spec=pltpu.PrefetchScalarGridSpec(
            num_scalar_prefetch=0,
            grid=(M_pad // br,),
            in_specs=[pl.BlockSpec((br, CN), lambda i: (i, 0)),
                      pl.BlockSpec((2, CN), lambda i: (0, 0))],
            out_specs=pl.BlockSpec((br, CN), lambda i: (i, 0))),
        compiler_params=pltpu.CompilerParams(
            dimension_semantics=("parallel",),
            vmem_limit_bytes=VMEM_LIMIT_BYTES),
    )(y_pad, ss)


# ---------------------------------------------------------------------------
# Plain-JAX glue: im2col patch extraction, (kh, kw, cin) column order,
# emitted directly in the activation dtype and already padded to k_pad.
# ---------------------------------------------------------------------------
def _im2col(x_nhwc, kh, kw, stride, pad, k_pad=None):
    N, H, W, C = x_nhwc.shape
    xp = jnp.pad(x_nhwc, ((0, 0), (pad, pad), (pad, pad), (0, 0)))
    OH = (H + 2 * pad - kh) // stride + 1
    OW = (W + 2 * pad - kw) // stride + 1
    cols = []
    for i in range(kh):
        for j in range(kw):
            cols.append(xp[:, i:i + stride * OH:stride,
                           j:j + stride * OW:stride, :])
    patches = jnp.concatenate(cols, axis=-1)
    K = kh * kw * C
    if k_pad is not None and k_pad > K:
        patches = jnp.pad(patches, ((0, 0), (0, 0), (0, 0), (0, k_pad - K)))
        K = k_pad
    return patches.reshape(N * OH * OW, K), (N, OH, OW)


# ---------------------------------------------------------------------------
# Parameters.
# ---------------------------------------------------------------------------
def _channels(n_channel_input, n_channel_output, n_filters):
    return [n_channel_input + n_channel_output, n_filters, n_filters * 2,
            n_filters * 4, n_filters * 8, n_filters * 16, 1]


def init_params(key, n_channel_input, n_channel_output, n_filters):
    chans = _channels(n_channel_input, n_channel_output, n_filters)
    params = []
    for li in range(6):
        key, kw_, kb_ = jax.random.split(key, 3)
        cin, cout = chans[li], chans[li + 1]
        # Weights stored as (KH, KW, Cin, Cout) (== torch weight transposed).
        w = jax.random.normal(kw_, (4, 4, cin, cout), jnp.float32) * 0.05
        b = jax.random.normal(kb_, (cout,), jnp.float32) * 0.05
        params.append(dict(w=w, b=b,
                           gamma=jnp.ones((cout,), jnp.float32),
                           beta=jnp.zeros((cout,), jnp.float32)))
    return params


def prepare_params(params):
    """Pre-pad / pre-cast all weights once, outside the forward critical path."""
    prepared = []
    n = len(params)
    for li, p in enumerate(params):
        kh, kw, cin, cout = p["w"].shape
        K = kh * kw * cin
        w_mat = p["w"].reshape(K, cout)
        if li == n - 1:
            # Final Cout=1 layer stays plain JAX (f32, unpadded).
            prepared.append(dict(w_mat=w_mat.astype(jnp.float32),
                                 b=p["b"].astype(jnp.float32)))
            continue
        CN = _round_up(cout, 128)
        K_pad = _round_up(K, 128)
        prepared.append(dict(
            w_mat=jnp.pad(w_mat, ((0, K_pad - K), (0, CN - cout))
                          ).astype(jnp.bfloat16),
            b=jnp.pad(p["b"], (0, CN - cout)).reshape(1, CN).astype(jnp.float32),
            gamma=jnp.pad(p["gamma"], (0, CN - cout)).astype(jnp.float32),
            beta=jnp.pad(p["beta"], (0, CN - cout)).astype(jnp.float32)))
    return prepared


# ---------------------------------------------------------------------------
# Forward pass.
# ---------------------------------------------------------------------------
def make_d_forward(n_channel_input, n_channel_output, n_filters):
    chans = _channels(n_channel_input, n_channel_output, n_filters)

    def d_forward(prepared, x_nchw):
        # NCHW -> NHWC, cast to bf16 once.
        h = jnp.transpose(x_nchw, (0, 2, 3, 1)).astype(jnp.bfloat16)
        n_layers = len(prepared)
        for li, lp in enumerate(prepared):
            stride = LAYER_STRIDES[li]
            cin, cout = chans[li], chans[li + 1]

            if li == n_layers - 1:
                # conv6 + sigmoid: Cout == 1 -> padded MXU call would be <1%
                # utilized; a tiny XLA dot is faster and saves a launch.
                patches, (N, OH, OW) = _im2col(h, 4, 4, stride, 1)
                y = jnp.dot(patches.astype(jnp.float32), lp["w_mat"]) + lp["b"]
                h = jax.nn.sigmoid(y).reshape(N, OH, OW, 1)
                continue

            K_pad = _round_up(4 * 4 * cin, 128)
            patches, (N, OH, OW) = _im2col(h, 4, 4, stride, 1, k_pad=K_pad)
            M = patches.shape[0]

            if LAYER_DO_BN[li]:
                y_pad, stats = _conv_layer(patches, lp["w_mat"], lp["b"],
                                           epilogue="none", do_stats=True,
                                           out_dtype=jnp.bfloat16)
                # Exact train-mode batch statistics from the f32 accumulator.
                mean = jnp.sum(stats[:, 0, :], axis=0) / M
                var = jnp.maximum(jnp.sum(stats[:, 1, :], axis=0) / M
                                  - mean * mean, 0.0)
                scale = lp["gamma"] * jax.lax.rsqrt(var + BN_EPS)
                shift = lp["beta"] - mean * scale
                y_pad = _bn_apply(y_pad, scale, shift, jnp.bfloat16)
            else:
                y_pad, _ = _conv_layer(patches, lp["w_mat"], lp["b"],
                                       epilogue="lrelu", do_stats=False,
                                       out_dtype=jnp.bfloat16)
            h = y_pad[:M, :cout].reshape(N, OH, OW, cout)

        return jnp.transpose(h.astype(jnp.float32), (0, 3, 1, 2))  # NHWC->NCHW

    return d_forward


if __name__ == "__main__":
    # Small deterministic config: n_channel_input=2, n_channel_output=2,
    # n_filters=4.  x is the already-concatenated (input, output) pair.
    # Spatial 32 is the smallest size surviving the six kernel-4 convs
    # (32 -> 16 -> 8 -> 4 -> 3 -> 2 -> 1).
    n_channel_input, n_channel_output, n_filters = 2, 2, 4
    key = jax.random.PRNGKey(0)
    kp, kx = jax.random.split(key)
    params = prepare_params(
        init_params(kp, n_channel_input, n_channel_output, n_filters))
    x = jax.random.normal(
        kx, (2, n_channel_input + n_channel_output, 32, 32), jnp.float32)

    fwd = jax.jit(make_d_forward(n_channel_input, n_channel_output, n_filters))
    out = jax.block_until_ready(fwd(params, x))

    assert out.shape == (2, 1, 1, 1), out.shape
    assert bool(jnp.all(jnp.isfinite(out)))
    assert bool(jnp.all((out >= 0.0) & (out <= 1.0)))  # sigmoid output range
    print("KERNEL_OK")
</pallas_src>

<mosaic_0001>
module attributes {stable_mosaic.version = 11 : i64} {
  func.func @kernel(%arg0: i32, %arg1: i32, %arg2: memref<512x128xbf16, #tpu.memory_space<vmem>>, %arg3: memref<128x128xbf16, #tpu.memory_space<vmem>>, %arg4: memref<1x128xf32, #tpu.memory_space<vmem>>, %arg5: memref<512x128xbf16, #tpu.memory_space<vmem>>) attributes {dimension_semantics = [#tpu.dimension_semantics<parallel>, #tpu.dimension_semantics<parallel>], iteration_bounds = array<i64: 1, 1>, scalar_prefetch = 0 : i64, scratch_operands = 0 : i64, tpu.core_type = #tpu.core_type<tc>, window_params = [{transform_indices = @transform_0, window_bounds = array<i64: 512, 128>}, {transform_indices = @transform_1, window_bounds = array<i64: 128, 128>}, {transform_indices = @transform_2, window_bounds = array<i64: 1, 128>}, {transform_indices = @transform_3, window_bounds = array<i64: 512, 128>}]} {
    %c0 = arith.constant 0 : index
    %c0_0 = arith.constant 0 : index
    %0 = vector.load %arg2[%c0, %c0_0] : memref<512x128xbf16, #tpu.memory_space<vmem>>, vector<512x128xbf16>
    %c0_1 = arith.constant 0 : index
    %c0_2 = arith.constant 0 : index
    %1 = vector.load %arg3[%c0_1, %c0_2] : memref<128x128xbf16, #tpu.memory_space<vmem>>, vector<128x128xbf16>
    %cst = arith.constant dense<0.000000e+00> : vector<512x128xf32>
    %2 = tpu.matmul %0, %1, %cst {dimension_numbers = #tpu.dot_dimension_numbers<[1], [0], [0], [1], [0, 0, 1, 1], [], []>} : vector<512x128xbf16>, vector<128x128xbf16>, vector<512x128xf32> -> vector<512x128xf32>
    %c0_3 = arith.constant 0 : index
    %c0_4 = arith.constant 0 : index
    %3 = vector.load %arg4[%c0_3, %c0_4] : memref<1x128xf32, #tpu.memory_space<vmem>>, vector<1x128xf32>
    %4 = vector.broadcast %3 : vector<1x128xf32> to vector<512x128xf32>
    %5 = arith.addf %2, %4 : vector<512x128xf32>
    %cst_5 = arith.constant 0.000000e+00 : f32
    %6 = vector.broadcast %cst_5 : f32 to vector<512x128xf32>
    %7 = arith.cmpf oge, %5, %6 : vector<512x128xf32>
    %cst_6 = arith.constant 2.000000e-01 : f32
    %8 = vector.broadcast %cst_6 : f32 to vector<512x128xf32>
    %9 = arith.mulf %8, %5 : vector<512x128xf32>
    %10 = arith.select %7, %5, %9 : vector<512x128xi1>, vector<512x128xf32>
    %11 = arith.truncf %10 : vector<512x128xf32> to vector<512x128xbf16>
    %c0_7 = arith.constant 0 : index
    %c0_8 = arith.constant 0 : index
    %12 = vector.load %arg5[%c0_7, %c0_8] : memref<512x128xbf16, #tpu.memory_space<vmem>>, vector<512x128xbf16>
    tpu.vector_store %arg5[%c0_7, %c0_8], %11 {strides = array<i32>} : memref<512x128xbf16, #tpu.memory_space<vmem>>, vector<512x128xbf16>,
    return
  }
  func.func @transform_0(%arg0: i32, %arg1: i32) -> (i32, i32) {
    %c0_i32 = arith.constant 0 : i32
    %c0_i32_0 = arith.constant 0 : i32
    return %arg0, %c0_i32 : i32, i32
  }
  func.func @transform_1(%arg0: i32, %arg1: i32) -> (i32, i32) {
    %c0_i32 = arith.constant 0 : i32
    %c0_i32_0 = arith.constant 0 : i32
    return %c0_i32, %arg1 : i32, i32
  }
  func.func @transform_2(%arg0: i32, %arg1: i32) -> (i32, i32) {
    %c0_i32 = arith.constant 0 : i32
    %c0_i32_0 = arith.constant 0 : i32
    return %c0_i32, %arg1 : i32, i32
  }
  func.func @transform_3(%arg0: i32, %arg1: i32) -> (i32, i32) {
    %c0_i32 = arith.constant 0 : i32
    return %arg0, %arg1 : i32, i32
  }
}

module attributes {stable_mosaic.version = 11 : i64} {
  func.func @kernel(%arg0: i32, %arg1: i32, %arg2: memref<128x128xbf16, #tpu.memory_space<vmem>>, %arg3: memref<128x128xbf16, #tpu.memory_space<vmem>>, %arg4: memref<1x128xf32, #tpu.memory_space<vmem>>, %arg5: memref<128x128xbf16, #tpu.memory_space<vmem>>, %arg6: memref<1x2x128xf32, #tpu.memory_space<vmem>>) attributes {dimension_semantics = [#tpu.dimension_semantics<parallel>, #tpu.dimension_semantics<parallel>], iteration_bounds = array<i64: 1, 1>, scalar_prefetch = 0 : i64, scratch_operands = 0 : i64, tpu.core_type = #tpu.core_type<tc>, window_params = [{transform_indices = @transform_0, window_bounds = array<i64: 128, 128>}, {transform_indices = @transform_1, window_bounds = array<i64: 128, 128>}, {transform_indices = @transform_2, window_bounds = array<i64: 1, 128>}, {transform_indices = @transform_3, window_bounds = array<i64: 128, 128>}, {transform_indices = @transform_4, window_bounds = array<i64: 1, 2, 128>}]} {
    %c0 = arith.constant 0 : index
    %c0_0 = arith.constant 0 : index
    %0 = vector.load %arg2[%c0, %c0_0] : memref<128x128xbf16, #tpu.memory_space<vmem>>, vector<128x128xbf16>
    %c0_1 = arith.constant 0 : index
    %c0_2 = arith.constant 0 : index
    %1 = vector.load %arg3[%c0_1, %c0_2] : memref<128x128xbf16, #tpu.memory_space<vmem>>, vector<128x128xbf16>
    %cst = arith.constant dense<0.000000e+00> : vector<128x128xf32>
    %2 = tpu.matmul %0, %1, %cst {dimension_numbers = #tpu.dot_dimension_numbers<[1], [0], [0], [1], [0, 0, 1, 1], [], []>} : vector<128x128xbf16>, vector<128x128xbf16>, vector<128x128xf32> -> vector<128x128xf32>
    %c0_3 = arith.constant 0 : index
    %c0_4 = arith.constant 0 : index
    %3 = vector.load %arg4[%c0_3, %c0_4] : memref<1x128xf32, #tpu.memory_space<vmem>>, vector<1x128xf32>
    %4 = vector.broadcast %3 : vector<1x128xf32> to vector<128x128xf32>
    %5 = arith.addf %2, %4 : vector<128x128xf32>
    %cst_5 = arith.constant dense<0.000000e+00> : vector<128xf32>
    %6 = vector.multi_reduction <add>, %5, %cst_5 [0] : vector<128x128xf32> to vector<128xf32>
    %7 = vector.shape_cast %6 : vector<128xf32> to vector<1x128xf32>
    %8 = arith.mulf %5, %5 : vector<128x128xf32>
    %cst_6 = arith.constant dense<0.000000e+00> : vector<128xf32>
    %9 = vector.multi_reduction <add>, %8, %cst_6 [0] : vector<128x128xf32> to vector<128xf32>
    %10 = vector.shape_cast %9 : vector<128xf32> to vector<1x128xf32>
    %11 = tpu.concatenate %7, %10 in 0 : vector<1x128xf32>, vector<1x128xf32> -> vector<2x128xf32>
    %c0_7 = arith.constant 0 : index
    %c0_8 = arith.constant 0 : index
    %c0_9 = arith.constant 0 : index
    %12 = vector.load %arg6[%c0_7, %c0_8, %c0_9] : memref<1x2x128xf32, #tpu.memory_space<vmem>>, vector<1x2x128xf32>
    %13 = vector.shape_cast %12 : vector<1x2x128xf32> to vector<2x128xf32>
    %14 = vector.shape_cast %11 : vector<2x128xf32> to vector<1x2x128xf32>
    tpu.vector_store %arg6[%c0_7, %c0_8, %c0_9], %14 {strides = array<i32>} : memref<1x2x128xf32, #tpu.memory_space<vmem>>, vector<1x2x128xf32>,
    %15 = arith.truncf %5 : vector<128x128xf32> to vector<128x128xbf16>
    %c0_10 = arith.constant 0 : index
    %c0_11 = arith.constant 0 : index
    %16 = vector.load %arg5[%c0_10, %c0_11] : memref<128x128xbf16, #tpu.memory_space<vmem>>, vector<128x128xbf16>
    tpu.vector_store %arg5[%c0_10, %c0_11], %15 {strides = array<i32>} : memref<128x128xbf16, #tpu.memory_space<vmem>>, vector<128x128xbf16>,
    return
  }
  func.func @transform_0(%arg0: i32, %arg1: i32) -> (i32, i32) {
    %c0_i32 = arith.constant 0 : i32
    %c0_i32_0 = arith.constant 0 : i32
    return %arg0, %c0_i32 : i32, i32
  }
  func.func @transform_1(%arg0: i32, %arg1: i32) -> (i32, i32) {
    %c0_i32 = arith.constant 0 : i32
    %c0_i32_0 = arith.constant 0 : i32
    return %c0_i32, %arg1 : i32, i32
  }
  func.func @transform_2(%arg0: i32, %arg1: i32) -> (i32, i32) {
    %c0_i32 = arith.constant 0 : i32
    %c0_i32_0 = arith.constant 0 : i32
    return %c0_i32, %arg1 : i32, i32
  }
  func.func @transform_3(%arg0: i32, %arg1: i32) -> (i32, i32) {
    %c0_i32 = arith.constant 0 : i32
    return %arg0, %arg1 : i32, i32
  }
  func.func @transform_4(%arg0: i32, %arg1: i32) -> (i32, i32, i32) {
    %c0_i32 = arith.constant 0 : i32
    %c0_i32_0 = arith.constant 0 : i32
    return %arg0, %c0_i32, %arg1 : i32, i32, i32
  }
}

module attributes {stable_mosaic.version = 11 : i64} {
  func.func @_bn_apply_kernel(%arg0: i32, %arg1: memref<128x128xbf16, #tpu.memory_space<vmem>>, %arg2: memref<2x128xf32, #tpu.memory_space<vmem>>, %arg3: memref<128x128xbf16, #tpu.memory_space<vmem>>) attributes {dimension_semantics = [#tpu.dimension_semantics<parallel>], iteration_bounds = array<i64: 1>, scalar_prefetch = 0 : i64, scratch_operands = 0 : i64, tpu.core_type = #tpu.core_type<tc>, window_params = [{transform_indices = @transform_0, window_bounds = array<i64: 128, 128>}, {pipeline_mode = #tpu.pipeline_mode<synchronous>, transform_indices = @transform_1, window_bounds = array<i64: 2, 128>}, {transform_indices = @transform_2, window_bounds = array<i64: 128, 128>}]} {
    %c0 = arith.constant 0 : index
    %c0_0 = arith.constant 0 : index
    %0 = vector.load %arg1[%c0, %c0_0] : memref<128x128xbf16, #tpu.memory_space<vmem>>, vector<128x128xbf16>
    %1 = arith.extf %0 : vector<128x128xbf16> to vector<128x128xf32>
    %c0_1 = arith.constant 0 : index
    %c0_2 = arith.constant 0 : index
    %2 = vector.load %arg2[%c0_1, %c0_2] : memref<2x128xf32, #tpu.memory_space<vmem>>, vector<1x128xf32>
    %3 = vector.broadcast %2 : vector<1x128xf32> to vector<128x128xf32>
    %4 = arith.mulf %1, %3 : vector<128x128xf32>
    %c1 = arith.constant 1 : index
    %c0_3 = arith.constant 0 : index
    %5 = vector.load %arg2[%c1, %c0_3] : memref<2x128xf32, #tpu.memory_space<vmem>>, vector<1x128xf32>
    %6 = vector.broadcast %5 : vector<1x128xf32> to vector<128x128xf32>
    %7 = arith.addf %4, %6 : vector<128x128xf32>
    %cst = arith.constant 0.000000e+00 : f32
    %8 = vector.broadcast %cst : f32 to vector<128x128xf32>
    %9 = arith.cmpf oge, %7, %8 : vector<128x128xf32>
    %cst_4 = arith.constant 2.000000e-01 : f32
    %10 = vector.broadcast %cst_4 : f32 to vector<128x128xf32>
    %11 = arith.mulf %10, %7 : vector<128x128xf32>
    %12 = arith.select %9, %7, %11 : vector<128x128xi1>, vector<128x128xf32>
    %13 = arith.truncf %12 : vector<128x128xf32> to vector<128x128xbf16>
    %c0_5 = arith.constant 0 : index
    %c0_6 = arith.constant 0 : index
    %14 = vector.load %arg3[%c0_5, %c0_6] : memref<128x128xbf16, #tpu.memory_space<vmem>>, vector<128x128xbf16>
    tpu.vector_store %arg3[%c0_5, %c0_6], %13 {strides = array<i32>} : memref<128x128xbf16, #tpu.memory_space<vmem>>, vector<128x128xbf16>,
    return
  }
  func.func @transform_0(%arg0: i32) -> (i32, i32) {
    %c0_i32 = arith.constant 0 : i32
    %c0_i32_0 = arith.constant 0 : i32
    return %arg0, %c0_i32 : i32, i32
  }
  func.func @transform_1(%arg0: i32) -> (i32, i32) {
    %c0_i32 = arith.constant 0 : i32
    %c0_i32_0 = arith.constant 0 : i32
    %c0_i32_1 = arith.constant 0 : i32
    return %c0_i32, %c0_i32_0 : i32, i32
  }
  func.func @transform_2(%arg0: i32) -> (i32, i32) {
    %c0_i32 = arith.constant 0 : i32
    %c0_i32_0 = arith.constant 0 : i32
    return %arg0, %c0_i32 : i32, i32
  }
}

module attributes {stable_mosaic.version = 11 : i64} {
  func.func @kernel(%arg0: i32, %arg1: i32, %arg2: memref<32x128xbf16, #tpu.memory_space<vmem>>, %arg3: memref<128x128xbf16, #tpu.memory_space<vmem>>, %arg4: memref<1x128xf32, #tpu.memory_space<vmem>>, %arg5: memref<32x128xbf16, #tpu.memory_space<vmem>>, %arg6: memref<1x2x128xf32, #tpu.memory_space<vmem>>) attributes {dimension_semantics = [#tpu.dimension_semantics<parallel>, #tpu.dimension_semantics<parallel>], iteration_bounds = array<i64: 1, 1>, scalar_prefetch = 0 : i64, scratch_operands = 0 : i64, tpu.core_type = #tpu.core_type<tc>, window_params = [{transform_indices = @transform_0, window_bounds = array<i64: 32, 128>}, {transform_indices = @transform_1, window_bounds = array<i64: 128, 128>}, {transform_indices = @transform_2, window_bounds = array<i64: 1, 128>}, {transform_indices = @transform_3, window_bounds = array<i64: 32, 128>}, {transform_indices = @transform_4, window_bounds = array<i64: 1, 2, 128>}]} {
    %c0 = arith.constant 0 : index
    %c0_0 = arith.constant 0 : index
    %0 = vector.load %arg2[%c0, %c0_0] : memref<32x128xbf16, #tpu.memory_space<vmem>>, vector<32x128xbf16>
    %c0_1 = arith.constant 0 : index
    %c0_2 = arith.constant 0 : index
    %1 = vector.load %arg3[%c0_1, %c0_2] : memref<128x128xbf16, #tpu.memory_space<vmem>>, vector<128x128xbf16>
    %cst = arith.constant dense<0.000000e+00> : vector<32x128xf32>
    %2 = tpu.matmul %0, %1, %cst {dimension_numbers = #tpu.dot_dimension_numbers<[1], [0], [0], [1], [0, 0, 1, 1], [], []>} : vector<32x128xbf16>, vector<128x128xbf16>, vector<32x128xf32> -> vector<32x128xf32>
    %c0_3 = arith.constant 0 : index
    %c0_4 = arith.constant 0 : index
    %3 = vector.load %arg4[%c0_3, %c0_4] : memref<1x128xf32, #tpu.memory_space<vmem>>, vector<1x128xf32>
    %4 = vector.broadcast %3 : vector<1x128xf32> to vector<32x128xf32>
    %5 = arith.addf %2, %4 : vector<32x128xf32>
    %cst_5 = arith.constant dense<0.000000e+00> : vector<128xf32>
    %6 = vector.multi_reduction <add>, %5, %cst_5 [0] : vector<32x128xf32> to vector<128xf32>
    %7 = vector.shape_cast %6 : vector<128xf32> to vector<1x128xf32>
    %8 = arith.mulf %5, %5 : vector<32x128xf32>
    %cst_6 = arith.constant dense<0.000000e+00> : vector<128xf32>
    %9 = vector.multi_reduction <add>, %8, %cst_6 [0] : vector<32x128xf32> to vector<128xf32>
    %10 = vector.shape_cast %9 : vector<128xf32> to vector<1x128xf32>
    %11 = tpu.concatenate %7, %10 in 0 : vector<1x128xf32>, vector<1x128xf32> -> vector<2x128xf32>
    %c0_7 = arith.constant 0 : index
    %c0_8 = arith.constant 0 : index
    %c0_9 = arith.constant 0 : index
    %12 = vector.load %arg6[%c0_7, %c0_8, %c0_9] : memref<1x2x128xf32, #tpu.memory_space<vmem>>, vector<1x2x128xf32>
    %13 = vector.shape_cast %12 : vector<1x2x128xf32> to vector<2x128xf32>
    %14 = vector.shape_cast %11 : vector<2x128xf32> to vector<1x2x128xf32>
    tpu.vector_store %arg6[%c0_7, %c0_8, %c0_9], %14 {strides = array<i32>} : memref<1x2x128xf32, #tpu.memory_space<vmem>>, vector<1x2x128xf32>,
    %15 = arith.truncf %5 : vector<32x128xf32> to vector<32x128xbf16>
    %c0_10 = arith.constant 0 : index
    %c0_11 = arith.constant 0 : index
    %16 = vector.load %arg5[%c0_10, %c0_11] : memref<32x128xbf16, #tpu.memory_space<vmem>>, vector<32x128xbf16>
    tpu.vector_store %arg5[%c0_10, %c0_11], %15 {strides = array<i32>} : memref<32x128xbf16, #tpu.memory_space<vmem>>, vector<32x128xbf16>,
    return
  }
  func.func @transform_0(%arg0: i32, %arg1: i32) -> (i32, i32) {
    %c0_i32 = arith.constant 0 : i32
    %c0_i32_0 = arith.constant 0 : i32
    return %arg0, %c0_i32 : i32, i32
  }
  func.func @transform_1(%arg0: i32, %arg1: i32) -> (i32, i32) {
    %c0_i32 = arith.constant 0 : i32
    %c0_i32_0 = arith.constant 0 : i32
    return %c0_i32, %arg1 : i32, i32
  }
  func.func @transform_2(%arg0: i32, %arg1: i32) -> (i32, i32) {
    %c0_i32 = arith.constant 0 : i32
    %c0_i32_0 = arith.constant 0 : i32
    return %c0_i32, %arg1 : i32, i32
  }
  func.func @transform_3(%arg0: i32, %arg1: i32) -> (i32, i32) {
    %c0_i32 = arith.constant 0 : i32
    return %arg0, %arg1 : i32, i32
  }
  func.func @transform_4(%arg0: i32, %arg1: i32) -> (i32, i32, i32) {
    %c0_i32 = arith.constant 0 : i32
    %c0_i32_0 = arith.constant 0 : i32
    return %arg0, %c0_i32, %arg1 : i32, i32, i32
  }
}

module attributes {stable_mosaic.version = 11 : i64} {
  func.func @_bn_apply_kernel(%arg0: i32, %arg1: memref<32x128xbf16, #tpu.memory_space<vmem>>, %arg2: memref<2x128xf32, #tpu.memory_space<vmem>>, %arg3: memref<32x128xbf16, #tpu.memory_space<vmem>>) attributes {dimension_semantics = [#tpu.dimension_semantics<parallel>], iteration_bounds = array<i64: 1>, scalar_prefetch = 0 : i64, scratch_operands = 0 : i64, tpu.core_type = #tpu.core_type<tc>, window_params = [{transform_indices = @transform_0, window_bounds = array<i64: 32, 128>}, {pipeline_mode = #tpu.pipeline_mode<synchronous>, transform_indices = @transform_1, window_bounds = array<i64: 2, 128>}, {transform_indices = @transform_2, window_bounds = array<i64: 32, 128>}]} {
    %c0 = arith.constant 0 : index
    %c0_0 = arith.constant 0 : index
    %0 = vector.load %arg1[%c0, %c0_0] : memref<32x128xbf16, #tpu.memory_space<vmem>>, vector<32x128xbf16>
    %1 = arith.extf %0 : vector<32x128xbf16> to vector<32x128xf32>
    %c0_1 = arith.constant 0 : index
    %c0_2 = arith.constant 0 : index
    %2 = vector.load %arg2[%c0_1, %c0_2] : memref<2x128xf32, #tpu.memory_space<vmem>>, vector<1x128xf32>
    %3 = vector.broadcast %2 : vector<1x128xf32> to vector<32x128xf32>
    %4 = arith.mulf %1, %3 : vector<32x128xf32>
    %c1 = arith.constant 1 : index
    %c0_3 = arith.constant 0 : index
    %5 = vector.load %arg2[%c1, %c0_3] : memref<2x128xf32, #tpu.memory_space<vmem>>, vector<1x128xf32>
    %6 = vector.broadcast %5 : vector<1x128xf32> to vector<32x128xf32>
    %7 = arith.addf %4, %6 : vector<32x128xf32>
    %cst = arith.constant 0.000000e+00 : f32
    %8 = vector.broadcast %cst : f32 to vector<32x128xf32>
    %9 = arith.cmpf oge, %7, %8 : vector<32x128xf32>
    %cst_4 = arith.constant 2.000000e-01 : f32
    %10 = vector.broadcast %cst_4 : f32 to vector<32x128xf32>
    %11 = arith.mulf %10, %7 : vector<32x128xf32>
    %12 = arith.select %9, %7, %11 : vector<32x128xi1>, vector<32x128xf32>
    %13 = arith.truncf %12 : vector<32x128xf32> to vector<32x128xbf16>
    %c0_5 = arith.constant 0 : index
    %c0_6 = arith.constant 0 : index
    %14 = vector.load %arg3[%c0_5, %c0_6] : memref<32x128xbf16, #tpu.memory_space<vmem>>, vector<32x128xbf16>
    tpu.vector_store %arg3[%c0_5, %c0_6], %13 {strides = array<i32>} : memref<32x128xbf16, #tpu.memory_space<vmem>>, vector<32x128xbf16>,
    return
  }
  func.func @transform_0(%arg0: i32) -> (i32, i32) {
    %c0_i32 = arith.constant 0 : i32
    %c0_i32_0 = arith.constant 0 : i32
    return %arg0, %c0_i32 : i32, i32
  }
  func.func @transform_1(%arg0: i32) -> (i32, i32) {
    %c0_i32 = arith.constant 0 : i32
    %c0_i32_0 = arith.constant 0 : i32
    %c0_i32_1 = arith.constant 0 : i32
    return %c0_i32, %c0_i32_0 : i32, i32
  }
  func.func @transform_2(%arg0: i32) -> (i32, i32) {
    %c0_i32 = arith.constant 0 : i32
    %c0_i32_0 = arith.constant 0 : i32
    return %arg0, %c0_i32 : i32, i32
  }
}

module attributes {stable_mosaic.version = 11 : i64} {
  func.func @kernel(%arg0: i32, %arg1: i32, %arg2: memref<32x256xbf16, #tpu.memory_space<vmem>>, %arg3: memref<256x128xbf16, #tpu.memory_space<vmem>>, %arg4: memref<1x128xf32, #tpu.memory_space<vmem>>, %arg5: memref<32x128xbf16, #tpu.memory_space<vmem>>, %arg6: memref<1x2x128xf32, #tpu.memory_space<vmem>>) attributes {dimension_semantics = [#tpu.dimension_semantics<parallel>, #tpu.dimension_semantics<parallel>], iteration_bounds = array<i64: 1, 1>, scalar_prefetch = 0 : i64, scratch_operands = 0 : i64, tpu.core_type = #tpu.core_type<tc>, window_params = [{transform_indices = @transform_0, window_bounds = array<i64: 32, 256>}, {transform_indices = @transform_1, window_bounds = array<i64: 256, 128>}, {transform_indices = @transform_2, window_bounds = array<i64: 1, 128>}, {transform_indices = @transform_3, window_bounds = array<i64: 32, 128>}, {transform_indices = @transform_4, window_bounds = array<i64: 1, 2, 128>}]} {
    %c0 = arith.constant 0 : index
    %c0_0 = arith.constant 0 : index
    %0 = vector.load %arg2[%c0, %c0_0] : memref<32x256xbf16, #tpu.memory_space<vmem>>, vector<32x256xbf16>
    %c0_1 = arith.constant 0 : index
    %c0_2 = arith.constant 0 : index
    %1 = vector.load %arg3[%c0_1, %c0_2] : memref<256x128xbf16, #tpu.memory_space<vmem>>, vector<256x128xbf16>
    %cst = arith.constant dense<0.000000e+00> : vector<32x128xf32>
    %2 = tpu.matmul %0, %1, %cst {dimension_numbers = #tpu.dot_dimension_numbers<[1], [0], [0], [1], [0, 0, 1, 1], [], []>} : vector<32x256xbf16>, vector<256x128xbf16>, vector<32x128xf32> -> vector<32x128xf32>
    %c0_3 = arith.constant 0 : index
    %c0_4 = arith.constant 0 : index
    %3 = vector.load %arg4[%c0_3, %c0_4] : memref<1x128xf32, #tpu.memory_space<vmem>>, vector<1x128xf32>
    %4 = vector.broadcast %3 : vector<1x128xf32> to vector<32x128xf32>
    %5 = arith.addf %2, %4 : vector<32x128xf32>
    %c32_i32 = arith.constant 32 : i32
    %6 = arith.muli %arg0, %c32_i32 : i32
    %7 = tpu.iota {dimensions = array<i32: 0>} : vector<32x1xi32>
    %8 = vector.broadcast %6 : i32 to vector<32x1xi32>
    %9 = arith.addi %7, %8 : vector<32x1xi32>
    %c18_i32 = arith.constant 18 : i32
    %10 = vector.broadcast %c18_i32 : i32 to vector<32x1xi32>
    %11 = arith.cmpi slt, %9, %10 : vector<32x1xi32>
    %12 = arith.extui %11 : vector<32x1xi1> to vector<32x1xi32>
    %13 = arith.sitofp %12 : vector<32x1xi32> to vector<32x1xf32>
    %14 = vector.broadcast %13 : vector<32x1xf32> to vector<32x128xf32>
    %15 = arith.mulf %5, %14 : vector<32x128xf32>
    %cst_5 = arith.constant dense<0.000000e+00> : vector<128xf32>
    %16 = vector.multi_reduction <add>, %15, %cst_5 [0] : vector<32x128xf32> to vector<128xf32>
    %17 = vector.shape_cast %16 : vector<128xf32> to vector<1x128xf32>
    %18 = arith.mulf %15, %15 : vector<32x128xf32>
    %cst_6 = arith.constant dense<0.000000e+00> : vector<128xf32>
    %19 = vector.multi_reduction <add>, %18, %cst_6 [0] : vector<32x128xf32> to vector<128xf32>
    %20 = vector.shape_cast %19 : vector<128xf32> to vector<1x128xf32>
    %21 = tpu.concatenate %17, %20 in 0 : vector<1x128xf32>, vector<1x128xf32> -> vector<2x128xf32>
    %c0_7 = arith.constant 0 : index
    %c0_8 = arith.constant 0 : index
    %c0_9 = arith.constant 0 : index
    %22 = vector.load %arg6[%c0_7, %c0_8, %c0_9] : memref<1x2x128xf32, #tpu.memory_space<vmem>>, vector<1x2x128xf32>
    %23 = vector.shape_cast %22 : vector<1x2x128xf32> to vector<2x128xf32>
    %24 = vector.shape_cast %21 : vector<2x128xf32> to vector<1x2x128xf32>
    tpu.vector_store %arg6[%c0_7, %c0_8, %c0_9], %24 {strides = array<i32>} : memref<1x2x128xf32, #tpu.memory_space<vmem>>, vector<1x2x128xf32>,
    %25 = arith.truncf %5 : vector<32x128xf32> to vector<32x128xbf16>
    %c0_10 = arith.constant 0 : index
    %c0_11 = arith.constant 0 : index
    %26 = vector.load %arg5[%c0_10, %c0_11] : memref<32x128xbf16, #tpu.memory_space<vmem>>, vector<32x128xbf16>
    tpu.vector_store %arg5[%c0_10, %c0_11], %25 {strides = array<i32>} : memref<32x128xbf16, #tpu.memory_space<vmem>>, vector<32x128xbf16>,
    return
  }
  func.func @transform_0(%arg0: i32, %arg1: i32) -> (i32, i32) {
    %c0_i32 = arith.constant 0 : i32
    %c0_i32_0 = arith.constant 0 : i32
    return %arg0, %c0_i32 : i32, i32
  }
  func.func @transform_1(%arg0: i32, %arg1: i32) -> (i32, i32) {
    %c0_i32 = arith.constant 0 : i32
    %c0_i32_0 = arith.constant 0 : i32
    return %c0_i32, %arg1 : i32, i32
  }
  func.func @transform_2(%arg0: i32, %arg1: i32) -> (i32, i32) {
    %c0_i32 = arith.constant 0 : i32
    %c0_i32_0 = arith.constant 0 : i32
    return %c0_i32, %arg1 : i32, i32
  }
  func.func @transform_3(%arg0: i32, %arg1: i32) -> (i32, i32) {
    %c0_i32 = arith.constant 0 : i32
    return %arg0, %arg1 : i32, i32
  }
  func.func @transform_4(%arg0: i32, %arg1: i32) -> (i32, i32, i32) {
    %c0_i32 = arith.constant 0 : i32
    %c0_i32_0 = arith.constant 0 : i32
    return %arg0, %c0_i32, %arg1 : i32, i32, i32
  }
}

module attributes {stable_mosaic.version = 11 : i64} {
  func.func @kernel(%arg0: i32, %arg1: i32, %arg2: memref<16x512xbf16, #tpu.memory_space<vmem>>, %arg3: memref<512x128xbf16, #tpu.memory_space<vmem>>, %arg4: memref<1x128xf32, #tpu.memory_space<vmem>>, %arg5: memref<16x128xbf16, #tpu.memory_space<vmem>>, %arg6: memref<1x2x128xf32, #tpu.memory_space<vmem>>) attributes {dimension_semantics = [#tpu.dimension_semantics<parallel>, #tpu.dimension_semantics<parallel>], iteration_bounds = array<i64: 1, 1>, scalar_prefetch = 0 : i64, scratch_operands = 0 : i64, tpu.core_type = #tpu.core_type<tc>, window_params = [{transform_indices = @transform_0, window_bounds = array<i64: 16, 512>}, {transform_indices = @transform_1, window_bounds = array<i64: 512, 128>}, {transform_indices = @transform_2, window_bounds = array<i64: 1, 128>}, {transform_indices = @transform_3, window_bounds = array<i64: 16, 128>}, {transform_indices = @transform_4, window_bounds = array<i64: 1, 2, 128>}]} {
    %c0 = arith.constant 0 : index
    %c0_0 = arith.constant 0 : index
    %0 = vector.load %arg2[%c0, %c0_0] : memref<16x512xbf16, #tpu.memory_space<vmem>>, vector<16x512xbf16>
    %c0_1 = arith.constant 0 : index
    %c0_2 = arith.constant 0 : index
    %1 = vector.load %arg3[%c0_1, %c0_2] : memref<512x128xbf16, #tpu.memory_space<vmem>>, vector<512x128xbf16>
    %cst = arith.constant dense<0.000000e+00> : vector<16x128xf32>
    %2 = tpu.matmul %0, %1, %cst {dimension_numbers = #tpu.dot_dimension_numbers<[1], [0], [0], [1], [0, 0, 1, 1], [], []>} : vector<16x512xbf16>, vector<512x128xbf16>, vector<16x128xf32> -> vector<16x128xf32>
    %c0_3 = arith.constant 0 : index
    %c0_4 = arith.constant 0 : index
    %3 = vector.load %arg4[%c0_3, %c0_4] : memref<1x128xf32, #tpu.memory_space<vmem>>, vector<1x128xf32>
    %4 = vector.broadcast %3 : vector<1x128xf32> to vector<16x128xf32>
    %5 = arith.addf %2, %4 : vector<16x128xf32>
    %c16_i32 = arith.constant 16 : i32
    %6 = arith.muli %arg0, %c16_i32 : i32
    %7 = tpu.iota {dimensions = array<i32: 0>} : vector<16x1xi32>
    %8 = vector.broadcast %6 : i32 to vector<16x1xi32>
    %9 = arith.addi %7, %8 : vector<16x1xi32>
    %c8_i32 = arith.constant 8 : i32
    %10 = vector.broadcast %c8_i32 : i32 to vector<16x1xi32>
    %11 = arith.cmpi slt, %9, %10 : vector<16x1xi32>
    %12 = arith.extui %11 : vector<16x1xi1> to vector<16x1xi32>
    %13 = arith.sitofp %12 : vector<16x1xi32> to vector<16x1xf32>
    %14 = vector.broadcast %13 : vector<16x1xf32> to vector<16x128xf32>
    %15 = arith.mulf %5, %14 : vector<16x128xf32>
    %cst_5 = arith.constant dense<0.000000e+00> : vector<128xf32>
    %16 = vector.multi_reduction <add>, %15, %cst_5 [0] : vector<16x128xf32> to vector<128xf32>
    %17 = vector.shape_cast %16 : vector<128xf32> to vector<1x128xf32>
    %18 = arith.mulf %15, %15 : vector<16x128xf32>
    %cst_6 = arith.constant dense<0.000000e+00> : vector<128xf32>
    %19 = vector.multi_reduction <add>, %18, %cst_6 [0] : vector<16x128xf32> to vector<128xf32>
    %20 = vector.shape_cast %19 : vector<128xf32> to vector<1x128xf32>
    %21 = tpu.concatenate %17, %20 in 0 : vector<1x128xf32>, vector<1x128xf32> -> vector<2x128xf32>
    %c0_7 = arith.constant 0 : index
    %c0_8 = arith.constant 0 : index
    %c0_9 = arith.constant 0 : index
    %22 = vector.load %arg6[%c0_7, %c0_8, %c0_9] : memref<1x2x128xf32, #tpu.memory_space<vmem>>, vector<1x2x128xf32>
    %23 = vector.shape_cast %22 : vector<1x2x128xf32> to vector<2x128xf32>
    %24 = vector.shape_cast %21 : vector<2x128xf32> to vector<1x2x128xf32>
    tpu.vector_store %arg6[%c0_7, %c0_8, %c0_9], %24 {strides = array<i32>} : memref<1x2x128xf32, #tpu.memory_space<vmem>>, vector<1x2x128xf32>,
    %25 = arith.truncf %5 : vector<16x128xf32> to vector<16x128xbf16>
    %c0_10 = arith.constant 0 : index
    %c0_11 = arith.constant 0 : index
    %26 = vector.load %arg5[%c0_10, %c0_11] : memref<16x128xbf16, #tpu.memory_space<vmem>>, vector<16x128xbf16>
    tpu.vector_store %arg5[%c0_10, %c0_11], %25 {strides = array<i32>} : memref<16x128xbf16, #tpu.memory_space<vmem>>, vector<16x128xbf16>,
    return
  }
  func.func @transform_0(%arg0: i32, %arg1: i32) -> (i32, i32) {
    %c0_i32 = arith.constant 0 : i32
    %c0_i32_0 = arith.constant 0 : i32
    return %arg0, %c0_i32 : i32, i32
  }
  func.func @transform_1(%arg0: i32, %arg1: i32) -> (i32, i32) {
    %c0_i32 = arith.constant 0 : i32
    %c0_i32_0 = arith.constant 0 : i32
    return %c0_i32, %arg1 : i32, i32
  }
  func.func @transform_2(%arg0: i32, %arg1: i32) -> (i32, i32) {
    %c0_i32 = arith.constant 0 : i32
    %c0_i32_0 = arith.constant 0 : i32
    return %c0_i32, %arg1 : i32, i32
  }
  func.func @transform_3(%arg0: i32, %arg1: i32) -> (i32, i32) {
    %c0_i32 = arith.constant 0 : i32
    return %arg0, %arg1 : i32, i32
  }
  func.func @transform_4(%arg0: i32, %arg1: i32) -> (i32, i32, i32) {
    %c0_i32 = arith.constant 0 : i32
    %c0_i32_0 = arith.constant 0 : i32
    return %arg0, %c0_i32, %arg1 : i32, i32, i32
  }
}

module attributes {stable_mosaic.version = 11 : i64} {
  func.func @_bn_apply_kernel(%arg0: i32, %arg1: memref<16x128xbf16, #tpu.memory_space<vmem>>, %arg2: memref<2x128xf32, #tpu.memory_space<vmem>>, %arg3: memref<16x128xbf16, #tpu.memory_space<vmem>>) attributes {dimension_semantics = [#tpu.dimension_semantics<parallel>], iteration_bounds = array<i64: 1>, scalar_prefetch = 0 : i64, scratch_operands = 0 : i64, tpu.core_type = #tpu.core_type<tc>, window_params = [{transform_indices = @transform_0, window_bounds = array<i64: 16, 128>}, {pipeline_mode = #tpu.pipeline_mode<synchronous>, transform_indices = @transform_1, window_bounds = array<i64: 2, 128>}, {transform_indices = @transform_2, window_bounds = array<i64: 16, 128>}]} {
    %c0 = arith.constant 0 : index
    %c0_0 = arith.constant 0 : index
    %0 = vector.load %arg1[%c0, %c0_0] : memref<16x128xbf16, #tpu.memory_space<vmem>>, vector<16x128xbf16>
    %1 = arith.extf %0 : vector<16x128xbf16> to vector<16x128xf32>
    %c0_1 = arith.constant 0 : index
    %c0_2 = arith.constant 0 : index
    %2 = vector.load %arg2[%c0_1, %c0_2] : memref<2x128xf32, #tpu.memory_space<vmem>>, vector<1x128xf32>
    %3 = vector.broadcast %2 : vector<1x128xf32> to vector<16x128xf32>
    %4 = arith.mulf %1, %3 : vector<16x128xf32>
    %c1 = arith.constant 1 : index
    %c0_3 = arith.constant 0 : index
    %5 = vector.load %arg2[%c1, %c0_3] : memref<2x128xf32, #tpu.memory_space<vmem>>, vector<1x128xf32>
    %6 = vector.broadcast %5 : vector<1x128xf32> to vector<16x128xf32>
    %7 = arith.addf %4, %6 : vector<16x128xf32>
    %cst = arith.constant 0.000000e+00 : f32
    %8 = vector.broadcast %cst : f32 to vector<16x128xf32>
    %9 = arith.cmpf oge, %7, %8 : vector<16x128xf32>
    %cst_4 = arith.constant 2.000000e-01 : f32
    %10 = vector.broadcast %cst_4 : f32 to vector<16x128xf32>
    %11 = arith.mulf %10, %7 : vector<16x128xf32>
    %12 = arith.select %9, %7, %11 : vector<16x128xi1>, vector<16x128xf32>
    %13 = arith.truncf %12 : vector<16x128xf32> to vector<16x128xbf16>
    %c0_5 = arith.constant 0 : index
    %c0_6 = arith.constant 0 : index
    %14 = vector.load %arg3[%c0_5, %c0_6] : memref<16x128xbf16, #tpu.memory_space<vmem>>, vector<16x128xbf16>
    tpu.vector_store %arg3[%c0_5, %c0_6], %13 {strides = array<i32>} : memref<16x128xbf16, #tpu.memory_space<vmem>>, vector<16x128xbf16>,
    return
  }
  func.func @transform_0(%arg0: i32) -> (i32, i32) {
    %c0_i32 = arith.constant 0 : i32
    %c0_i32_0 = arith.constant 0 : i32
    return %arg0, %c0_i32 : i32, i32
  }
  func.func @transform_1(%arg0: i32) -> (i32, i32) {
    %c0_i32 = arith.constant 0 : i32
    %c0_i32_0 = arith.constant 0 : i32
    %c0_i32_1 = arith.constant 0 : i32
    return %c0_i32, %c0_i32_0 : i32, i32
  }
  func.func @transform_2(%arg0: i32) -> (i32, i32) {
    %c0_i32 = arith.constant 0 : i32
    %c0_i32_0 = arith.constant 0 : i32
    return %arg0, %c0_i32 : i32, i32
  }
}

</mosaic_0001>

<bundles_post_ra>
// kernel: d_forward.9
= control target key start
LH: loop header
LB: loop body
LE: loop exit
PB: predicated region body
PF: predicated region fallthrough
CT: control target
= control target key end

     0   :  { %s1997_s1 = inlined_call_operand.vmem [shape: bf16[128,128], index: 1, kind: input, shape index: {}]   ;;  %s1998_s0 = inlined_call_operand.vmem [shape: bf16[512,128], index: 0, kind: input, shape index: {}]   ;;  %s1999_s2 = inlined_call_operand.vmem [shape: f32[1,128], index: 2, kind: input, shape index: {}]   ;;  %s2000_s3 = inlined_call_operand.vmem [shape: bf16[512,128], index: 3, kind: output, shape index: {}]  }
   0x1   :  { %v1643_v0 = vld [vmem:[%s1997_s1] sm:$0xff]   ;;  %v1644_v1 = vld [vmem:[%s1997_s1 + $0x8] sm:$0xff]   ;;  %v1645_v2 = vld [vmem:[%s1997_s1 + $0x10] sm:$0xff]  }
   0x2   :  { %1547 = vmatprep.subr.bf16.mxu0 %v1643_v0  ;;  %1627 = vmatprep.subr.bf16.mxu1 %v1643_v0  ;;  %v1646_v3 = vld [vmem:[%s1997_s1 + $0x18] sm:$0xff]   ;;  %v1651_v4 = vld [vmem:[%s1998_s0] sm:$0xff]   ;;  %v1648_v7 = vld [vmem:[%s1997_s1 + $0x28] sm:$0xff]  }
   0x3   :  { %1548 = vmatpush3.bf16.msra.mxu0 %v1643_v0  ;;  %1635 = vmatpush3.bf16.msra.mxu1 %v1643_v0  ;;  %v1652_v5 = vld [vmem:[%s1998_s0 + $0x80] sm:$0xff]   ;;  %v1649_v8 = vld [vmem:[%s1997_s1 + $0x30] sm:$0xff]   ;;  %v1650_v9 = vld [vmem:[%s1997_s1 + $0x38] sm:$0xff]  }
   0x4   :  { %1549 = vmatprep.subr.bf16.mxu0 %v1644_v1  ;;  %1628 = vmatprep.subr.bf16.mxu1 %v1644_v1  ;;  %v1647_v6 = vld [vmem:[%s1997_s1 + $0x20] sm:$0xff]   ;;  %v1653_v10 = vld [vmem:[%s1998_s0 + $0x8] sm:$0xff]   ;;  %v1655_v12 = vld [vmem:[%s1998_s0 + $0x10] sm:$0xff]  }
   0x5   :  { %1563 = vmatprep.mubr.bf16.mxu0 %v1651_v4  ;;  %1595 = vmatprep.mubr.bf16.mxu1 %v1652_v5  ;;  %v1654_v11 = vld [vmem:[%s1998_s0 + $0x88] sm:$0xff]   ;;  %v1656_v13 = vld [vmem:[%s1998_s0 + $0x90] sm:$0xff]   ;;  %v1657_v14 = vld [vmem:[%s1998_s0 + $0x18] sm:$0xff]  }
   0x6   :  { %v1658_v15 = vld [vmem:[%s1998_s0 + $0x98] sm:$0xff]   ;;  %v1659_v16 = vld [vmem:[%s1998_s0 + $0x20] sm:$0xff]   ;;  %v1661_v18 = vld [vmem:[%s1998_s0 + $0x28] sm:$0xff]  }
   0x7   :  { %1550 = vmatpush3.bf16.msra.mxu0 %v1644_v1  ;;  %1636 = vmatpush3.bf16.msra.mxu1 %v1644_v1  ;;  %v1660_v17 = vld [vmem:[%s1998_s0 + $0xa0] sm:$0xff]   ;;  %v1662_v19 = vld [vmem:[%s1998_s0 + $0xa8] sm:$0xff]   ;;  %v1663_v20 = vld [vmem:[%s1998_s0 + $0x30] sm:$0xff]  }
   0x8   :  { %1551 = vmatprep.subr.bf16.mxu0 %v1645_v2  ;;  %1629 = vmatprep.subr.bf16.mxu1 %v1645_v2  ;;  %v1664_v21 = vld [vmem:[%s1998_s0 + $0xb0] sm:$0xff]   ;;  %v1665_v22 = vld [vmem:[%s1998_s0 + $0x38] sm:$0xff]   ;;  %v1667_v24 = vld [vmem:[%s1998_s0 + $0x40] sm:$0xff]  }
   0x9   :  { %v1666_v23 = vld [vmem:[%s1998_s0 + $0xb8] sm:$0xff]   ;;  %v1668_v25 = vld [vmem:[%s1998_s0 + $0xc0] sm:$0xff]   ;;  %v1669_v26 = vld [vmem:[%s1998_s0 + $0x48] sm:$0xff]  }
   0xa   :  { %v1670_v27 = vld [vmem:[%s1998_s0 + $0xc8] sm:$0xff]   ;;  %v1671_v28 = vld [vmem:[%s1998_s0 + $0x50] sm:$0xff]   ;;  %v1673_v30 = vld [vmem:[%s1998_s0 + $0x58] sm:$0xff]  }
   0xb   :  { %1552 = vmatpush3.bf16.msra.mxu0 %v1645_v2  ;;  %1637 = vmatpush3.bf16.msra.mxu1 %v1645_v2  ;;  %v1672_v29 = vld [vmem:[%s1998_s0 + $0xd0] sm:$0xff]   ;;  %v1674_v31 = vld [vmem:[%s1998_s0 + $0xd8] sm:$0xff]   ;;  %v1675_v32 = vld [vmem:[%s1998_s0 + $0x60] sm:$0xff]  }
   0xc   :  { %1553 = vmatprep.subr.bf16.mxu0 %v1646_v3  ;;  %1630 = vmatprep.subr.bf16.mxu1 %v1646_v3  ;;  %v1676_v33 = vld [vmem:[%s1998_s0 + $0xe0] sm:$0xff]   ;;  %v1677_v34 = vld [vmem:[%s1998_s0 + $0x68] sm:$0xff]   ;;  %v1679_v36 = vld [vmem:[%s1998_s0 + $0x70] sm:$0xff]  }
   0xd   :  { %v1678_v35 = vld [vmem:[%s1998_s0 + $0xe8] sm:$0xff]   ;;  %v1680_v37 = vld [vmem:[%s1998_s0 + $0xf0] sm:$0xff]   ;;  %v1681_v38 = vld [vmem:[%s1998_s0 + $0x78] sm:$0xff]  }
   0xe   :  { %v1682_v39 = vld [vmem:[%s1998_s0 + $0xf8] sm:$0xff]   ;;  %v1826_v40 = vld [vmem:[%s1999_s2] ss:$0 sm:$0xff] }
   0xf   :  { %1554 = vmatpush3.bf16.msra.mxu0 %v1646_v3  ;;  %1638 = vmatpush3.bf16.msra.mxu1 %v1646_v3 }
  0x10   :  { %1555 = vmatprep.subr.bf16.mxu0 %v1647_v6  ;;  %1631 = vmatprep.subr.bf16.mxu1 %v1647_v6 }
  0x13   :  { %1556 = vmatpush3.bf16.msra.mxu0 %v1647_v6  ;;  %1639 = vmatpush3.bf16.msra.mxu1 %v1647_v6 }
  0x14   :  { %1557 = vmatprep.subr.bf16.mxu0 %v1648_v7  ;;  %1632 = vmatprep.subr.bf16.mxu1 %v1648_v7 }
  0x17   :  { %1558 = vmatpush3.bf16.msra.mxu0 %v1648_v7  ;;  %1640 = vmatpush3.bf16.msra.mxu1 %v1648_v7 }
  0x18   :  { %1559 = vmatprep.subr.bf16.mxu0 %v1649_v8  ;;  %1633 = vmatprep.subr.bf16.mxu1 %v1649_v8 }
  0x1b   :  { %1560 = vmatpush3.bf16.msra.mxu0 %v1649_v8  ;;  %1641 = vmatpush3.bf16.msra.mxu1 %v1649_v8 }
  0x1c   :  { %1561 = vmatprep.subr.bf16.mxu0 %v1650_v9  ;;  %1634 = vmatprep.subr.bf16.mxu1 %v1650_v9 }
  0x1f   :  { %1562 = vmatpush3.bf16.msra.mxu0 %v1650_v9  ;;  %1642 = vmatpush3.bf16.msra.mxu1 %v1650_v9 }
  0x22   :  { %1564 = vmatmul.mubr.bf16.vlgmr.msra.gmra.mrb[0].mxu0 %v1653_v10  ;;  %1596 = vmatmul.mubr.bf16.vlgmr.msra.gmra.mrb[0].mxu1 %v1654_v11 }
  0x23   :  { %1567 = vmatprep.mubr.bf16.mxu0 %v1655_v12  ;;  %1599 = vmatprep.mubr.bf16.mxu1 %v1656_v13 }
  0x2a   :  { %1568 = vmatmul.mubr.bf16.gmra.mrb[4].mxu0 %v1657_v14  ;;  %1600 = vmatmul.mubr.bf16.gmra.mrb[4].mxu1 %v1658_v15 }
  0x2b   :  { %1571 = vmatprep.mubr.bf16.mxu0 %v1659_v16  ;;  %1603 = vmatprep.mubr.bf16.mxu1 %v1660_v17 }
  0x32   :  { %1572 = vmatmul.mubr.bf16.gmra.mrb[8].mxu0 %v1661_v18  ;;  %1604 = vmatmul.mubr.bf16.gmra.mrb[8].mxu1 %v1662_v19 }
  0x33   :  { %1575 = vmatprep.mubr.bf16.mxu0 %v1663_v20  ;;  %1607 = vmatprep.mubr.bf16.mxu1 %v1664_v21 }
  0x3a   :  { %1576 = vmatmul.mubr.bf16.gmra.mrb[12].mxu0 %v1665_v22  ;;  %1608 = vmatmul.mubr.bf16.gmra.mrb[12].mxu1 %v1666_v23 }
  0x3b   :  { %1579 = vmatprep.mubr.bf16.mxu0 %v1667_v24  ;;  %1611 = vmatprep.mubr.bf16.mxu1 %v1668_v25 }
  0x42   :  { %1580 = vmatmul.mubr.bf16.gmra.mrb[16].mxu0 %v1669_v26  ;;  %1612 = vmatmul.mubr.bf16.gmra.mrb[16].mxu1 %v1670_v27 }
  0x43   :  { %1583 = vmatprep.mubr.bf16.mxu0 %v1671_v28  ;;  %1615 = vmatprep.mubr.bf16.mxu1 %v1672_v29 }
  0x4a   :  { %1584 = vmatmul.mubr.bf16.gmra.mrb[20].mxu0 %v1673_v30  ;;  %1616 = vmatmul.mubr.bf16.gmra.mrb[20].mxu1 %v1674_v31 }
  0x4b   :  { %1587 = vmatprep.mubr.bf16.mxu0 %v1675_v32  ;;  %1619 = vmatprep.mubr.bf16.mxu1 %v1676_v33 }
  0x52   :  { %1588 = vmatmul.mubr.bf16.gmra.mrb[24].mxu0 %v1677_v34  ;;  %1620 = vmatmul.mubr.bf16.gmra.mrb[24].mxu1 %v1678_v35 }
  0x53   :  { %1591 = vmatprep.mubr.bf16.mxu0 %v1679_v36  ;;  %1623 = vmatprep.mubr.bf16.mxu1 %v1680_v37 }
  0x5a   :  { %1592 = vmatmul.mubr.bf16.gmra.mrb[28].mxu0 %v1681_v38  ;;  %1624 = vmatmul.mubr.bf16.gmra.mrb[28].mxu1 %v1682_v39 }
  0xf5   :  { %v1565_v41 = vpop.f32.mrb[0].mxu0  ;;  %v1597_v42 = vpop.f32.mrb[0].mxu1 }
  0xf6   :  { %v385_v43 = vadd.f32 %v1565_v41, %v1826_v40  ;;  %v513_v44 = vadd.f32 %v1597_v42, %v1826_v40  ;;  %v376_v45 = vpop.f32.mrb[1].mxu0  ;;  %v504_v46 = vpop.f32.mrb[1].mxu1 }
  0xf7   :  { %v377_v47 = vadd.f32 %v1826_v40, %v376_v45  ;;  %v505_v48 = vadd.f32 %v1826_v40, %v504_v46  ;;  %v1566_v49 = vpop.f32.mrb[2].mxu0  ;;  %v1598_v50 = vpop.f32.mrb[2].mxu1 }
  0xf8   :  { %vm633_vm0 = vcmp.ge.f32.partialorder %v385_v43, 0.0  ;;  %v697_v51 = vmul.f32 0.2, %v385_v43  ;;  %vm665_vm1 = vcmp.ge.f32.partialorder %v513_v44, 0.0  ;;  %v729_v52 = vmul.f32 0.2, %v513_v44 }
  0xf9   :  { %vm631_vm2 = vcmp.ge.f32.partialorder %v377_v47, 0.0  ;;  %v695_v53 = vmul.f32 0.2, %v377_v47  ;;  %vm663_vm3 = vcmp.ge.f32.partialorder %v505_v48, 0.0  ;;  %v727_v54 = vmul.f32 0.2, %v505_v48 }
  0xfa   :  { %v388_v55 = vadd.f32 %v1566_v49, %v1826_v40  ;;  %v516_v56 = vadd.f32 %v1598_v50, %v1826_v40  ;;  %v379_v57 = vpop.f32.mrb[3].mxu0  ;;  %v507_v58 = vpop.f32.mrb[3].mxu1  ;;  %v761_v59 = vsel %vm633_vm0, %v385_v43, %v697_v51  ;;  %v793_v60 = vsel %vm665_vm1, %v513_v44, %v729_v52 }
  0xfb   :  { %v380_v61 = vadd.f32 %v1826_v40, %v379_v57  ;;  %v508_v62 = vadd.f32 %v1826_v40, %v507_v58  ;;  %v759_v3 = vsel %vm631_vm2, %v377_v47, %v695_v53  ;;  %v791_v4 = vsel %vm663_vm3, %v505_v48, %v727_v54 }
  0xfc   :  { %vm634_vm4 = vcmp.ge.f32.partialorder %v388_v55, 0.0  ;;  %v698_v63 = vmul.f32 0.2, %v388_v55  ;;  %vm666_vm5 = vcmp.ge.f32.partialorder %v516_v56, 0.0  ;;  %v730_v0 = vmul.f32 0.2, %v516_v56 }
  0xfd   :  { %vm632_vm6 = vcmp.ge.f32.partialorder %v380_v61, 0.0  ;;  %v696_v1 = vmul.f32 0.2, %v380_v61  ;;  %vm664_vm7 = vcmp.ge.f32.partialorder %v508_v62, 0.0  ;;  %v728_v2 = vmul.f32 0.2, %v508_v62 }
  0xfe   :  { %v762_v5 = vsel %vm634_vm4, %v388_v55, %v698_v63  ;;  %v794_v6 = vsel %vm666_vm5, %v516_v56, %v730_v0  ;;  %v1569_v7 = vpop.f32.mrb[4].mxu0  ;;  %v1601_v8 = vpop.f32.mrb[4].mxu1 }
  0xff   :  { %v1324_v9 = vpack.c.bf16 %v762_v5, %v761_v59  ;;  %v1404_v10 = vpack.c.bf16 %v794_v6, %v793_v60  ;;  %v760_v11 = vsel %vm632_vm6, %v380_v61, %v696_v1  ;;  %v792_v12 = vsel %vm664_vm7, %v508_v62, %v728_v2  ;;  %v392_v13 = vpop.f32.mrb[5].mxu0  ;;  %v520_v14 = vpop.f32.mrb[5].mxu1 }
 0x100   :  { %v1319_v15 = vpack.c.bf16 %v760_v11, %v759_v3  ;;  %v1399_v16 = vpack.c.bf16 %v792_v12, %v791_v4  ;;  %v401_v17 = vadd.f32 %v1569_v7, %v1826_v40  ;;  %v529_v18 = vadd.f32 %v1601_v8, %v1826_v40  ;;  %v1570_v19 = vpop.f32.mrb[6].mxu0  ;;  %v1602_v20 = vpop.f32.mrb[6].mxu1 }
 0x101   :  { %1476 = vst [vmem:[%s2000_s3 + $0x8] sm:$0xff] %v1324_v9   ;;  %1492 = vst [vmem:[%s2000_s3 + $0x88] sm:$0xff] %v1404_v10   ;;  %v393_v21 = vadd.f32 %v1826_v40, %v392_v13  ;;  %v521_v22 = vadd.f32 %v1826_v40, %v520_v14  ;;  %v404_v23 = vadd.f32 %v1570_v19, %v1826_v40  ;;  %v395_v25 = vpop.f32.mrb[7].mxu0  ;;  %v523_v26 = vpop.f32.mrb[7].mxu1 }
 0x102   :  { %v532_v24 = vadd.f32 %v1602_v20, %v1826_v40  ;;  %1320 = vst [vmem:[%s2000_s3] sm:$0xff] %v1319_v15   ;;  %1491 = vst [vmem:[%s2000_s3 + $0x80] sm:$0xff] %v1399_v16   ;;  %vm637_vm8 = vcmp.ge.f32.partialorder %v401_v17, 0.0  ;;  %v701_v27 = vmul.f32 0.2, %v401_v17  ;;  %vm669_vm9 = vcmp.ge.f32.partialorder %v529_v18, 0.0 }
 0x103   :  { %v733_v28 = vmul.f32 0.2, %v529_v18  ;;  %vm635_vm10 = vcmp.ge.f32.partialorder %v393_v21, 0.0  ;;  %v699_v29 = vmul.f32 0.2, %v393_v21  ;;  %vm667_vm11 = vcmp.ge.f32.partialorder %v521_v22, 0.0 }
 0x104   :  { %v731_v30 = vmul.f32 0.2, %v521_v22  ;;  %v765_v31 = vsel %vm637_vm8, %v401_v17, %v701_v27  ;;  %vm638_vm12 = vcmp.ge.f32.partialorder %v404_v23, 0.0  ;;  %v702_v33 = vmul.f32 0.2, %v404_v23 }
 0x105   :  { %v797_v32 = vsel %vm669_vm9, %v529_v18, %v733_v28  ;;  %v763_v34 = vsel %vm635_vm10, %v393_v21, %v699_v29  ;;  %vm670_vm13 = vcmp.ge.f32.partialorder %v532_v24, 0.0  ;;  %v734_v36 = vmul.f32 0.2, %v532_v24  ;;  %v1573_v37 = vpop.f32.mrb[8].mxu0  ;;  %v1605_v38 = vpop.f32.mrb[8].mxu1 }
 0x106   :  { %v795_v35 = vsel %vm667_vm11, %v521_v22, %v731_v30  ;;  %v766_v39 = vsel %vm638_vm12, %v404_v23, %v702_v33  ;;  %v396_v41 = vadd.f32 %v1826_v40, %v395_v25  ;;  %v524_v42 = vadd.f32 %v1826_v40, %v523_v26  ;;  %v408_v44 = vpop.f32.mrb[9].mxu0  ;;  %v536_v45 = vpop.f32.mrb[9].mxu1 }
 0x107   :  { %v417_v43 = vadd.f32 %v1573_v37, %v1826_v40  ;;  %v1334_v46 = vpack.c.bf16 %v766_v39, %v765_v31  ;;  %v798_v47 = vsel %vm670_vm13, %v532_v24, %v734_v36  ;;  %v545_v48 = vadd.f32 %v1605_v38, %v1826_v40  ;;  %v1574_v50 = vpop.f32.mrb[10].mxu0  ;;  %v1606_v51 = vpop.f32.mrb[10].mxu1 }
 0x108   :  { %v409_v49 = vadd.f32 %v1826_v40, %v408_v44  ;;  %v1414_v52 = vpack.c.bf16 %v798_v47, %v797_v32  ;;  %vm636_vm14 = vcmp.ge.f32.partialorder %v396_v41, 0.0  ;;  %v700_v53 = vmul.f32 0.2, %v396_v41  ;;  %v411_v54 = vpop.f32.mrb[11].mxu0  ;;  %v539_v55 = vpop.f32.mrb[11].mxu1 }
 0x109   :  { %vm668_vm15 = vcmp.ge.f32.partialorder %v524_v42, 0.0  ;;  %1478 = vst [vmem:[%s2000_s3 + $0x18] sm:$0xff] %v1334_v46   ;;  %v732_v56 = vmul.f32 0.2, %v524_v42  ;;  %vm641_vm0 = vcmp.ge.f32.partialorder %v417_v43, 0.0  ;;  %vm673_vm1 = vcmp.ge.f32.partialorder %v545_v48, 0.0 }
 0x10a   :  { %v705_v57 = vmul.f32 0.2, %v417_v43  ;;  %1494 = vst [vmem:[%s2000_s3 + $0x98] sm:$0xff] %v1414_v52   ;;  %v764_v58 = vsel %vm636_vm14, %v396_v41, %v700_v53  ;;  %v737_v59 = vmul.f32 0.2, %v545_v48  ;;  %vm639_vm2 = vcmp.ge.f32.partialorder %v409_v49, 0.0 }
 0x10b   :  { %v703_v60 = vmul.f32 0.2, %v409_v49  ;;  %v1329_v61 = vpack.c.bf16 %v764_v58, %v763_v34  ;;  %v796_v62 = vsel %vm668_vm15, %v524_v42, %v732_v56  ;;  %v537_v0 = vadd.f32 %v1826_v40, %v536_v45 }
 0x10c   :  { %v769_v63 = vsel %vm641_vm0, %v417_v43, %v705_v57  ;;  %v1409_v1 = vpack.c.bf16 %v796_v62, %v795_v35  ;;  %v801_v2 = vsel %vm673_vm1, %v545_v48, %v737_v59  ;;  %v420_v4 = vadd.f32 %v1574_v50, %v1826_v40 }
 0x10d   :  { %v767_v3 = vsel %vm639_vm2, %v409_v49, %v703_v60  ;;  %1477 = vst [vmem:[%s2000_s3 + $0x10] sm:$0xff] %v1329_v61   ;;  %vm671_vm3 = vcmp.ge.f32.partialorder %v537_v0, 0.0  ;;  %v735_v5 = vmul.f32 0.2, %v537_v0  ;;  %v548_v6 = vadd.f32 %v1606_v51, %v1826_v40  ;;  %v1577_v8 = vpop.f32.mrb[12].mxu0  ;;  %v1609_v9 = vpop.f32.mrb[12].mxu1 }
 0x10e   :  { %v412_v7 = vadd.f32 %v1826_v40, %v411_v54  ;;  %1493 = vst [vmem:[%s2000_s3 + $0x90] sm:$0xff] %v1409_v1   ;;  %vm642_vm4 = vcmp.ge.f32.partialorder %v420_v4, 0.0  ;;  %v706_v10 = vmul.f32 0.2, %v420_v4  ;;  %v540_v11 = vadd.f32 %v1826_v40, %v539_v55  ;;  %v424_v13 = vpop.f32.mrb[13].mxu0  ;;  %v552_v14 = vpop.f32.mrb[13].mxu1 }
 0x10f   :  { %v433_v12 = vadd.f32 %v1577_v8, %v1826_v40  ;;  %v799_v15 = vsel %vm671_vm3, %v537_v0, %v735_v5  ;;  %vm674_vm5 = vcmp.ge.f32.partialorder %v548_v6, 0.0  ;;  %v738_v16 = vmul.f32 0.2, %v548_v6  ;;  %v1578_v17 = vpop.f32.mrb[14].mxu0  ;;  %v1610_v18 = vpop.f32.mrb[14].mxu1 }
 0x110   :  { %vm640_vm6 = vcmp.ge.f32.partialorder %v412_v7, 0.0  ;;  %v770_v19 = vsel %vm642_vm4, %v420_v4, %v706_v10  ;;  %v704_v20 = vmul.f32 0.2, %v412_v7  ;;  %vm672_vm7 = vcmp.ge.f32.partialorder %v540_v11, 0.0  ;;  %v427_v22 = vpop.f32.mrb[15].mxu0  ;;  %v555_v26 = vpop.f32.mrb[15].mxu1 }
 0x111   :  { %v736_v21 = vmul.f32 0.2, %v540_v11  ;;  %v1344_v23 = vpack.c.bf16 %v770_v19, %v769_v63  ;;  %v802_v24 = vsel %vm674_vm5, %v548_v6, %v738_v16  ;;  %vm645_vm8 = vcmp.ge.f32.partialorder %v433_v12, 0.0 }
 0x112   :  { %v709_v25 = vmul.f32 0.2, %v433_v12  ;;  %v1424_v27 = vpack.c.bf16 %v802_v24, %v801_v2  ;;  %v768_v28 = vsel %vm640_vm6, %v412_v7, %v704_v20  ;;  %v561_v30 = vadd.f32 %v1609_v9, %v1826_v40 }
 0x113   :  { %v800_v29 = vsel %vm672_vm7, %v540_v11, %v736_v21  ;;  %1480 = vst [vmem:[%s2000_s3 + $0x28] sm:$0xff] %v1344_v23   ;;  %v1339_v31 = vpack.c.bf16 %v768_v28, %v767_v3  ;;  %v425_v34 = vadd.f32 %v1826_v40, %v424_v13  ;;  %v553_v36 = vadd.f32 %v1826_v40, %v552_v14 }
 0x114   :  { %v1419_v32 = vpack.c.bf16 %v800_v29, %v799_v15  ;;  %v773_v33 = vsel %vm645_vm8, %v433_v12, %v709_v25  ;;  %1496 = vst [vmem:[%s2000_s3 + $0xa8] sm:$0xff] %v1424_v27   ;;  %vm677_vm9 = vcmp.ge.f32.partialorder %v561_v30, 0.0  ;;  %v741_v35 = vmul.f32 0.2, %v561_v30 }
 0x115   :  { %v436_v37 = vadd.f32 %v1578_v17, %v1826_v40  ;;  %1479 = vst [vmem:[%s2000_s3 + $0x20] sm:$0xff] %v1339_v31   ;;  %vm643_vm10 = vcmp.ge.f32.partialorder %v425_v34, 0.0  ;;  %v707_v38 = vmul.f32 0.2, %v425_v34  ;;  %v564_v39 = vadd.f32 %v1610_v18, %v1826_v40  ;;  %v1581_v42 = vpop.f32.mrb[16].mxu0  ;;  %v1613_v43 = vpop.f32.mrb[16].mxu1 }
 0x116   :  { %1495 = vst [vmem:[%s2000_s3 + $0xa0] sm:$0xff] %v1419_v32   ;;  %v428_v41 = vadd.f32 %v1826_v40, %v427_v22  ;;  %v805_v44 = vsel %vm677_vm9, %v561_v30, %v741_v35  ;;  %vm675_vm11 = vcmp.ge.f32.partialorder %v553_v36, 0.0  ;;  %v739_v45 = vmul.f32 0.2, %v553_v36  ;;  %v440_v46 = vpop.f32.mrb[17].mxu0  ;;  %v568_v47 = vpop.f32.mrb[17].mxu1 }
 0x117   :  { %vm646_vm12 = vcmp.ge.f32.partialorder %v436_v37, 0.0  ;;  %v771_v48 = vsel %vm643_vm10, %v425_v34, %v707_v38  ;;  %v710_v49 = vmul.f32 0.2, %v436_v37  ;;  %vm678_vm13 = vcmp.ge.f32.partialorder %v564_v39, 0.0  ;;  %v1582_v51 = vpop.f32.mrb[18].mxu0  ;;  %v1614_v55 = vpop.f32.mrb[18].mxu1 }
 0x118   :  { %v742_v50 = vmul.f32 0.2, %v564_v39  ;;  %v803_v52 = vsel %vm675_vm11, %v553_v36, %v739_v45  ;;  %vm644_vm14 = vcmp.ge.f32.partialorder %v428_v41, 0.0  ;;  %v708_v53 = vmul.f32 0.2, %v428_v41  ;;  %v443_v56 = vpop.f32.mrb[19].mxu0 }
 0x119   :  { %v556_v54 = vadd.f32 %v1826_v40, %v555_v26  ;;  %v774_v57 = vsel %vm646_vm12, %v436_v37, %v710_v49  ;;  %v449_v59 = vadd.f32 %v1581_v42, %v1826_v40  ;;  %v577_v60 = vadd.f32 %v1613_v43, %v1826_v40  ;;  %v571_v61 = vpop.f32.mrb[19].mxu1 }
 0x11a   :  { %v806_v58 = vsel %vm678_vm13, %v564_v39, %v742_v50  ;;  %v1354_v62 = vpack.c.bf16 %v774_v57, %v773_v33  ;;  %v772_v0 = vsel %vm644_vm14, %v428_v41, %v708_v53  ;;  %v441_v5 = vadd.f32 %v1826_v40, %v440_v46 }
 0x11b   :  { %v1434_v63 = vpack.c.bf16 %v806_v58, %v805_v44  ;;  %vm676_vm15 = vcmp.ge.f32.partialorder %v556_v54, 0.0  ;;  %v1349_v1 = vpack.c.bf16 %v772_v0, %v771_v48  ;;  %v740_v2 = vmul.f32 0.2, %v556_v54 }
 0x11c   :  { %vm649_vm0 = vcmp.ge.f32.partialorder %v449_v59, 0.0  ;;  %v713_v3 = vmul.f32 0.2, %v449_v59  ;;  %1482 = vst [vmem:[%s2000_s3 + $0x38] sm:$0xff] %v1354_v62   ;;  %vm681_vm1 = vcmp.ge.f32.partialorder %v577_v60, 0.0  ;;  %v569_v6 = vadd.f32 %v1826_v40, %v568_v47 }
 0x11d   :  { %1498 = vst [vmem:[%s2000_s3 + $0xb8] sm:$0xff] %v1434_v63   ;;  %v745_v4 = vmul.f32 0.2, %v577_v60  ;;  %1481 = vst [vmem:[%s2000_s3 + $0x30] sm:$0xff] %v1349_v1   ;;  %v804_v7 = vsel %vm676_vm15, %v556_v54, %v740_v2  ;;  %v452_v9 = vadd.f32 %v1582_v51, %v1826_v40  ;;  %v580_v10 = vadd.f32 %v1614_v55, %v1826_v40  ;;  %v1585_v11 = vpop.f32.mrb[20].mxu0  ;;  %v1617_v12 = vpop.f32.mrb[20].mxu1 }
 0x11e   :  { %v777_v8 = vsel %vm649_vm0, %v449_v59, %v713_v3  ;;  %v1429_v13 = vpack.c.bf16 %v804_v7, %v803_v52  ;;  %vm647_vm2 = vcmp.ge.f32.partialorder %v441_v5, 0.0  ;;  %v711_v15 = vmul.f32 0.2, %v441_v5  ;;  %v456_v16 = vpop.f32.mrb[21].mxu0  ;;  %v584_v17 = vpop.f32.mrb[21].mxu1 }
 0x11f   :  { %v809_v14 = vsel %vm681_vm1, %v577_v60, %v745_v4  ;;  %vm679_vm3 = vcmp.ge.f32.partialorder %v569_v6, 0.0  ;;  %v743_v18 = vmul.f32 0.2, %v569_v6  ;;  %vm650_vm4 = vcmp.ge.f32.partialorder %v452_v9, 0.0  ;;  %v1586_v23 = vpop.f32.mrb[22].mxu0  ;;  %v1618_v24 = vpop.f32.mrb[22].mxu1 }
 0x120   :  { %v714_v19 = vmul.f32 0.2, %v452_v9  ;;  %1497 = vst [vmem:[%s2000_s3 + $0xb0] sm:$0xff] %v1429_v13   ;;  %v775_v20 = vsel %vm647_vm2, %v441_v5, %v711_v15  ;;  %vm682_vm5 = vcmp.ge.f32.partialorder %v580_v10, 0.0  ;;  %v746_v21 = vmul.f32 0.2, %v580_v10 }
 0x121   :  { %v444_v22 = vadd.f32 %v1826_v40, %v443_v56  ;;  %v807_v25 = vsel %vm679_vm3, %v569_v6, %v743_v18  ;;  %v572_v27 = vadd.f32 %v1826_v40, %v571_v61  ;;  %v465_v28 = vadd.f32 %v1585_v11, %v1826_v40  ;;  %v459_v29 = vpop.f32.mrb[23].mxu0  ;;  %v587_v30 = vpop.f32.mrb[23].mxu1 }
 0x122   :  { %v778_v26 = vsel %vm650_vm4, %v452_v9, %v714_v19  ;;  %v810_v32 = vsel %vm682_vm5, %v580_v10, %v746_v21  ;;  %v593_v38 = vadd.f32 %v1617_v12, %v1826_v40  ;;  %v457_v39 = vadd.f32 %v1826_v40, %v456_v16 }
 0x123   :  { %v1364_v31 = vpack.c.bf16 %v778_v26, %v777_v8  ;;  %vm648_vm6 = vcmp.ge.f32.partialorder %v444_v22, 0.0  ;;  %v712_v33 = vmul.f32 0.2, %v444_v22  ;;  %v1444_v34 = vpack.c.bf16 %v810_v32, %v809_v14 }
 0x124   :  { %vm680_vm7 = vcmp.ge.f32.partialorder %v572_v27, 0.0  ;;  %v744_v35 = vmul.f32 0.2, %v572_v27  ;;  %vm653_vm8 = vcmp.ge.f32.partialorder %v465_v28, 0.0  ;;  %v717_v37 = vmul.f32 0.2, %v465_v28 }
 0x125   :  { %1484 = vst [vmem:[%s2000_s3 + $0x48] sm:$0xff] %v1364_v31   ;;  %v776_v36 = vsel %vm648_vm6, %v444_v22, %v712_v33  ;;  %1500 = vst [vmem:[%s2000_s3 + $0xc8] sm:$0xff] %v1444_v34   ;;  %v585_v43 = vadd.f32 %v1826_v40, %v584_v17  ;;  %v468_v44 = vadd.f32 %v1586_v23, %v1826_v40  ;;  %v1589_v45 = vpop.f32.mrb[24].mxu0  ;;  %v1621_v46 = vpop.f32.mrb[24].mxu1  ;;  %vm685_vm9 = vcmp.ge.f32.partialorder %v593_v38, 0.0 }
 0x126   :  { %v1359_v41 = vpack.c.bf16 %v776_v36, %v775_v20  ;;  %v808_v42 = vsel %vm680_vm7, %v572_v27, %v744_v35  ;;  %v749_v48 = vmul.f32 0.2, %v593_v38  ;;  %v472_v49 = vpop.f32.mrb[25].mxu0  ;;  %v600_v50 = vpop.f32.mrb[25].mxu1  ;;  %v781_v51 = vsel %vm653_vm8, %v465_v28, %v717_v37 }
 0x127   :  { %v1439_v47 = vpack.c.bf16 %v808_v42, %v807_v25  ;;  %vm651_vm10 = vcmp.ge.f32.partialorder %v457_v39, 0.0  ;;  %v715_v52 = vmul.f32 0.2, %v457_v39  ;;  %v747_v53 = vmul.f32 0.2, %v585_v43  ;;  %v1590_v56 = vpop.f32.mrb[26].mxu0 }
 0x128   :  { %1483 = vst [vmem:[%s2000_s3 + $0x40] sm:$0xff] %v1359_v41   ;;  %vm683_vm11 = vcmp.ge.f32.partialorder %v585_v43, 0.0  ;;  %vm654_vm12 = vcmp.ge.f32.partialorder %v468_v44, 0.0  ;;  %v718_v54 = vmul.f32 0.2, %v468_v44  ;;  %v596_v55 = vadd.f32 %v1618_v24, %v1826_v40  ;;  %v1622_v57 = vpop.f32.mrb[26].mxu1 }
 0x129   :  { %1499 = vst [vmem:[%s2000_s3 + $0xc0] sm:$0xff] %v1439_v47   ;;  %v813_v58 = vsel %vm685_vm9, %v593_v38, %v749_v48  ;;  %v779_v59 = vsel %vm651_vm10, %v457_v39, %v715_v52  ;;  %v460_v60 = vadd.f32 %v1826_v40, %v459_v29  ;;  %v588_v61 = vadd.f32 %v1826_v40, %v587_v30  ;;  %v475_v62 = vpop.f32.mrb[27].mxu0  ;;  %v603_v63 = vpop.f32.mrb[27].mxu1 }
 0x12a   :  { %v782_v0 = vsel %vm654_vm12, %v468_v44, %v718_v54  ;;  %vm686_vm13 = vcmp.ge.f32.partialorder %v596_v55, 0.0  ;;  %v750_v1 = vmul.f32 0.2, %v596_v55  ;;  %v481_v2 = vadd.f32 %v1589_v45, %v1826_v40 }
 0x12b   :  { %v1374_v3 = vpack.c.bf16 %v782_v0, %v781_v51  ;;  %vm652_vm14 = vcmp.ge.f32.partialorder %v460_v60, 0.0  ;;  %v716_v4 = vmul.f32 0.2, %v460_v60  ;;  %vm684_vm15 = vcmp.ge.f32.partialorder %v588_v61, 0.0 }
 0x12c   :  { %v814_v5 = vsel %vm686_vm13, %v596_v55, %v750_v1  ;;  %v748_v6 = vmul.f32 0.2, %v588_v61  ;;  %vm657_vm0 = vcmp.ge.f32.partialorder %v481_v2, 0.0  ;;  %v721_v7 = vmul.f32 0.2, %v481_v2 }
 0x12d   :  { %1486 = vst [vmem:[%s2000_s3 + $0x58] sm:$0xff] %v1374_v3   ;;  %v1454_v8 = vpack.c.bf16 %v814_v5, %v813_v58  ;;  %v780_v9 = vsel %vm652_vm14, %v460_v60, %v716_v4  ;;  %v609_v10 = vadd.f32 %v1621_v46, %v1826_v40  ;;  %v473_v11 = vadd.f32 %v1826_v40, %v472_v49  ;;  %v1593_v12 = vpop.f32.mrb[28].mxu0  ;;  %v1625_v13 = vpop.f32.mrb[28].mxu1 }
 0x12e   :  { %v811_v14 = vsel %vm683_vm11, %v585_v43, %v747_v53  ;;  %v1369_v15 = vpack.c.bf16 %v780_v9, %v779_v59  ;;  %v812_v16 = vsel %vm684_vm15, %v588_v61, %v748_v6  ;;  %v601_v17 = vadd.f32 %v1826_v40, %v600_v50  ;;  %v488_v18 = vpop.f32.mrb[29].mxu0  ;;  %v616_v19 = vpop.f32.mrb[29].mxu1 }
 0x12f   :  { %1502 = vst [vmem:[%s2000_s3 + $0xd8] sm:$0xff] %v1454_v8   ;;  %v1449_v20 = vpack.c.bf16 %v812_v16, %v811_v14  ;;  %vm689_vm1 = vcmp.ge.f32.partialorder %v609_v10, 0.0  ;;  %v753_v21 = vmul.f32 0.2, %v609_v10  ;;  %vm655_vm2 = vcmp.ge.f32.partialorder %v473_v11, 0.0  ;;  %v1594_v22 = vpop.f32.mrb[30].mxu0 }
 0x130   :  { %v1626_v23 = vpop.f32.mrb[30].mxu1  ;;  %1485 = vst [vmem:[%s2000_s3 + $0x50] sm:$0xff] %v1369_v15   ;;  %v785_v24 = vsel %vm657_vm0, %v481_v2, %v721_v7  ;;  %v719_v25 = vmul.f32 0.2, %v473_v11  ;;  %vm687_vm3 = vcmp.ge.f32.partialorder %v601_v17, 0.0  ;;  %v484_v26 = vadd.f32 %v1590_v56, %v1826_v40  ;;  %v491_v27 = vpop.f32.mrb[31].mxu0 }
 0x131   :  { %1501 = vst [vmem:[%s2000_s3 + $0xd0] sm:$0xff] %v1449_v20   ;;  %v751_v28 = vmul.f32 0.2, %v601_v17  ;;  %v612_v29 = vadd.f32 %v1622_v57, %v1826_v40  ;;  %v476_v30 = vadd.f32 %v1826_v40, %v475_v62  ;;  %v604_v31 = vadd.f32 %v1826_v40, %v603_v63  ;;  %v619_v32 = vpop.f32.mrb[31].mxu1 }
 0x132   :  { %v817_v33 = vsel %vm689_vm1, %v609_v10, %v753_v21  ;;  %v783_v34 = vsel %vm655_vm2, %v473_v11, %v719_v25  ;;  %vm658_vm4 = vcmp.ge.f32.partialorder %v484_v26, 0.0  ;;  %v722_v35 = vmul.f32 0.2, %v484_v26 }
 0x133   :  { %vm690_vm5 = vcmp.ge.f32.partialorder %v612_v29, 0.0  ;;  %v754_v36 = vmul.f32 0.2, %v612_v29  ;;  %vm656_vm6 = vcmp.ge.f32.partialorder %v476_v30, 0.0  ;;  %v720_v37 = vmul.f32 0.2, %v476_v30 }
 0x134   :  { %v786_v38 = vsel %vm658_vm4, %v484_v26, %v722_v35  ;;  %vm688_vm7 = vcmp.ge.f32.partialorder %v604_v31, 0.0  ;;  %v752_v39 = vmul.f32 0.2, %v604_v31  ;;  %v497_v41 = vadd.f32 %v1593_v12, %v1826_v40 }
 0x135   :  { %v1384_v42 = vpack.c.bf16 %v786_v38, %v785_v24  ;;  %v818_v43 = vsel %vm690_vm5, %v612_v29, %v754_v36  ;;  %v784_v44 = vsel %vm656_vm6, %v476_v30, %v720_v37  ;;  %v625_v45 = vadd.f32 %v1625_v13, %v1826_v40 }
 0x136   :  { %v815_v46 = vsel %vm687_vm3, %v601_v17, %v751_v28  ;;  %v1464_v47 = vpack.c.bf16 %v818_v43, %v817_v33  ;;  %v1379_v48 = vpack.c.bf16 %v784_v44, %v783_v34  ;;  %v816_v49 = vsel %vm688_vm7, %v604_v31, %v752_v39 }
 0x137   :  { %1488 = vst [vmem:[%s2000_s3 + $0x68] sm:$0xff] %v1384_v42   ;;  %v1459_v50 = vpack.c.bf16 %v816_v49, %v815_v46  ;;  %vm661_vm8 = vcmp.ge.f32.partialorder %v497_v41, 0.0  ;;  %v725_v51 = vmul.f32 0.2, %v497_v41  ;;  %v757_v52 = vmul.f32 0.2, %v625_v45 }
 0x138   :  { %1504 = vst [vmem:[%s2000_s3 + $0xe8] sm:$0xff] %v1464_v47   ;;  %1487 = vst [vmem:[%s2000_s3 + $0x60] sm:$0xff] %v1379_v48   ;;  %v489_v53 = vadd.f32 %v1826_v40, %v488_v18  ;;  %v617_v54 = vadd.f32 %v1826_v40, %v616_v19  ;;  %v500_v55 = vadd.f32 %v1594_v22, %v1826_v40  ;;  %vm693_vm9 = vcmp.ge.f32.partialorder %v625_v45, 0.0 }
 0x139   :  { %v628_v56 = vadd.f32 %v1626_v23, %v1826_v40  ;;  %1503 = vst [vmem:[%s2000_s3 + $0xe0] sm:$0xff] %v1459_v50   ;;  %v492_v57 = vadd.f32 %v1826_v40, %v491_v27  ;;  %v620_v58 = vadd.f32 %v1826_v40, %v619_v32  ;;  %v789_v59 = vsel %vm661_vm8, %v497_v41, %v725_v51 }
 0x13a   :  { %vm659_vm10 = vcmp.ge.f32.partialorder %v489_v53, 0.0  ;;  %v723_v60 = vmul.f32 0.2, %v489_v53  ;;  %v755_v61 = vmul.f32 0.2, %v617_v54  ;;  %vm662_vm11 = vcmp.ge.f32.partialorder %v500_v55, 0.0 }
 0x13b   :  { %v726_v62 = vmul.f32 0.2, %v500_v55  ;;  %vm694_vm12 = vcmp.ge.f32.partialorder %v628_v56, 0.0  ;;  %v758_v63 = vmul.f32 0.2, %v628_v56  ;;  %v821_v0 = vsel %vm693_vm9, %v625_v45, %v757_v52 }
 0x13c   :  { %vm691_vm13 = vcmp.ge.f32.partialorder %v617_v54, 0.0  ;;  %vm660_vm14 = vcmp.ge.f32.partialorder %v492_v57, 0.0  ;;  %v724_v1 = vmul.f32 0.2, %v492_v57  ;;  %vm692_vm15 = vcmp.ge.f32.partialorder %v620_v58, 0.0 }
 0x13d   :  { %v790_v2 = vsel %vm662_vm11, %v500_v55, %v726_v62  ;;  %v822_v3 = vsel %vm694_vm12, %v628_v56, %v758_v63  ;;  %v756_v4 = vmul.f32 0.2, %v620_v58  ;;  %v787_v5 = vsel %vm659_vm10, %v489_v53, %v723_v60 }
 0x13e   :  { %v1394_v6 = vpack.c.bf16 %v790_v2, %v789_v59  ;;  %v1474_v7 = vpack.c.bf16 %v822_v3, %v821_v0  ;;  %v788_v40 = vsel %vm660_vm14, %v492_v57, %v724_v1  ;;  %v819_v8 = vsel %vm691_vm13, %v617_v54, %v755_v61 }
 0x13f   :  { %v1389_v9 = vpack.c.bf16 %v788_v40, %v787_v5  ;;  %v820_v10 = vsel %vm692_vm15, %v620_v58, %v756_v4 }
 0x140   :  { %1490 = vst [vmem:[%s2000_s3 + $0x78] sm:$0xff] %v1394_v6   ;;  %1506 = vst [vmem:[%s2000_s3 + $0xf8] sm:$0xff] %v1474_v7   ;;  %v1469_v11 = vpack.c.bf16 %v820_v10, %v819_v8 }
 0x141   :  { %1489 = vst [vmem:[%s2000_s3 + $0x70] sm:$0xff] %v1389_v9  }
 0x142   :  { %1505 = vst [vmem:[%s2000_s3 + $0xf0] sm:$0xff] %v1469_v11  }

// kernel: d_forward.11
= control target key start
LH: loop header
LB: loop body
LE: loop exit
PB: predicated region body
PF: predicated region fallthrough
CT: control target
= control target key end

     0   :  { %s443_s0 = inlined_call_operand.vmem [shape: bf16[128,128], index: 0, kind: input, shape index: {}]   ;;  %s444_s1 = inlined_call_operand.vmem [shape: f32[2,128], index: 1, kind: input, shape index: {}]   ;;  %s445_s2 = inlined_call_operand.vmem [shape: bf16[128,128], index: 2, kind: output, shape index: {}]  }
   0x1   :  { %v252_v0 = vld [vmem:[%s443_s0] sm:$0xff]   ;;  %v323_v4 = vld [vmem:[%s443_s0 + $0x8] sm:$0xff]   ;;  %v324_v5 = vld [vmem:[%s443_s0 + $0x10] sm:$0xff]  }
   0x2   :  { %v358_v1 = vld [vmem:[%s444_s1] ss:$0 sm:$0xff]  ;;  %v253_v2 = vunpack.c.l.bf16 %v252_v0  ;;  %v254_v3 = vunpack.c.h.bf16 %v252_v0  ;;  %v325_v6 = vld [vmem:[%s443_s0 + $0x18] sm:$0xff]   ;;  %v372_v7 = vld [vmem:[%s444_s1 + $0x1] ss:$0 sm:$0xff]  ;;  %v257_v8 = vunpack.c.l.bf16 %v323_v4  ;;  %v258_v9 = vunpack.c.h.bf16 %v323_v4 }
   0x3   :  { %v261_v10 = vunpack.c.l.bf16 %v324_v5  ;;  %v262_v11 = vunpack.c.h.bf16 %v324_v5  ;;  %v265_v14 = vunpack.c.l.bf16 %v325_v6  ;;  %v266_v15 = vunpack.c.h.bf16 %v325_v6  ;;  %v326_v34 = vld [vmem:[%s443_s0 + $0x20] sm:$0xff]   ;;  %v327_v35 = vld [vmem:[%s443_s0 + $0x28] sm:$0xff]   ;;  %v328_v48 = vld [vmem:[%s443_s0 + $0x30] sm:$0xff]  }
   0x4   :  { %v48_v12 = vmul.f32 %v253_v2, %v358_v1  ;;  %v49_v13 = vmul.f32 %v254_v3, %v358_v1  ;;  %v50_v16 = vmul.f32 %v257_v8, %v358_v1  ;;  %v51_v17 = vmul.f32 %v258_v9, %v358_v1  ;;  %v329_v4 = vld [vmem:[%s443_s0 + $0x38] sm:$0xff]  }
   0x5   :  { %v52_v18 = vmul.f32 %v261_v10, %v358_v1  ;;  %v53_v19 = vmul.f32 %v262_v11, %v358_v1  ;;  %v54_v22 = vmul.f32 %v265_v14, %v358_v1  ;;  %v55_v23 = vmul.f32 %v266_v15, %v358_v1 }
   0x6   :  { %v69_v20 = vadd.f32 %v372_v7, %v48_v12  ;;  %v70_v21 = vadd.f32 %v372_v7, %v49_v13  ;;  %v71_v24 = vadd.f32 %v372_v7, %v50_v16  ;;  %v72_v25 = vadd.f32 %v372_v7, %v51_v17 }
   0x7   :  { %v73_v26 = vadd.f32 %v372_v7, %v52_v18  ;;  %v74_v27 = vadd.f32 %v372_v7, %v53_v19  ;;  %v75_v42 = vadd.f32 %v372_v7, %v54_v22  ;;  %v76_v43 = vadd.f32 %v372_v7, %v55_v23 }
   0x8   :  { %vm85_vm0 = vcmp.ge.f32.partialorder %v69_v20, 0.0  ;;  %vm86_vm1 = vcmp.ge.f32.partialorder %v70_v21, 0.0  ;;  %v101_v28 = vmul.f32 0.2, %v69_v20  ;;  %v102_v29 = vmul.f32 0.2, %v70_v21 }
   0x9   :  { %vm87_vm2 = vcmp.ge.f32.partialorder %v71_v24, 0.0  ;;  %vm88_vm3 = vcmp.ge.f32.partialorder %v72_v25, 0.0  ;;  %v103_v30 = vmul.f32 0.2, %v71_v24  ;;  %v104_v31 = vmul.f32 0.2, %v72_v25 }
   0xa   :  { %v117_v32 = vsel %vm85_vm0, %v69_v20, %v101_v28  ;;  %v118_v33 = vsel %vm86_vm1, %v70_v21, %v102_v29  ;;  %vm89_vm4 = vcmp.ge.f32.partialorder %v73_v26, 0.0  ;;  %vm90_vm5 = vcmp.ge.f32.partialorder %v74_v27, 0.0 }
   0xb   :  { %v286_v36 = vpack.c.bf16 %v118_v33, %v117_v32  ;;  %v119_v37 = vsel %vm87_vm2, %v71_v24, %v103_v30  ;;  %v120_v38 = vsel %vm88_vm3, %v72_v25, %v104_v31  ;;  %v105_v39 = vmul.f32 0.2, %v73_v26 }
   0xc   :  { %v291_v40 = vpack.c.bf16 %v120_v38, %v119_v37  ;;  %v106_v41 = vmul.f32 0.2, %v74_v27  ;;  %v269_v45 = vunpack.c.l.bf16 %v326_v34  ;;  %v270_v46 = vunpack.c.h.bf16 %v326_v34 }
   0xd   :  { %287 = vst [vmem:[%s445_s2] sm:$0xff] %v286_v36   ;;  %v121_v44 = vsel %vm89_vm4, %v73_v26, %v105_v39  ;;  %v273_v47 = vunpack.c.l.bf16 %v327_v35  ;;  %vm91_vm6 = vcmp.ge.f32.partialorder %v75_v42, 0.0  ;;  %vm92_vm7 = vcmp.ge.f32.partialorder %v76_v43, 0.0 }
   0xe   :  { %330 = vst [vmem:[%s445_s2 + $0x8] sm:$0xff] %v291_v40   ;;  %v122_v49 = vsel %vm90_vm5, %v74_v27, %v106_v41  ;;  %v107_v50 = vmul.f32 0.2, %v75_v42  ;;  %v108_v52 = vmul.f32 0.2, %v76_v43  ;;  %v56_v53 = vmul.f32 %v269_v45, %v358_v1 }
   0xf   :  { %v296_v51 = vpack.c.bf16 %v122_v49, %v121_v44  ;;  %v57_v54 = vmul.f32 %v270_v46, %v358_v1  ;;  %v274_v56 = vunpack.c.h.bf16 %v327_v35  ;;  %v58_v57 = vmul.f32 %v273_v47, %v358_v1 }
  0x10   :  { %v123_v55 = vsel %vm91_vm6, %v75_v42, %v107_v50  ;;  %v277_v58 = vunpack.c.l.bf16 %v328_v48  ;;  %v124_v59 = vsel %vm92_vm7, %v76_v43, %v108_v52  ;;  %v77_v60 = vadd.f32 %v372_v7, %v56_v53 }
  0x11   :  { %331 = vst [vmem:[%s445_s2 + $0x10] sm:$0xff] %v296_v51   ;;  %v78_v61 = vadd.f32 %v372_v7, %v57_v54  ;;  %v278_v62 = vunpack.c.h.bf16 %v328_v48  ;;  %v301_v63 = vpack.c.bf16 %v124_v59, %v123_v55  ;;  %v59_v0 = vmul.f32 %v274_v56, %v358_v1 }
  0x12   :  { %v79_v2 = vadd.f32 %v372_v7, %v58_v57  ;;  %v60_v3 = vmul.f32 %v277_v58, %v358_v1  ;;  %vm93_vm8 = vcmp.ge.f32.partialorder %v77_v60, 0.0  ;;  %v109_v5 = vmul.f32 0.2, %v77_v60 }
  0x13   :  { %vm94_vm9 = vcmp.ge.f32.partialorder %v78_v61, 0.0  ;;  %v110_v6 = vmul.f32 0.2, %v78_v61  ;;  %332 = vst [vmem:[%s445_s2 + $0x18] sm:$0xff] %v301_v63   ;;  %v80_v8 = vadd.f32 %v372_v7, %v59_v0  ;;  %v61_v10 = vmul.f32 %v278_v62, %v358_v1 }
  0x14   :  { %vm95_vm10 = vcmp.ge.f32.partialorder %v79_v2, 0.0  ;;  %v111_v9 = vmul.f32 0.2, %v79_v2  ;;  %v125_v11 = vsel %vm93_vm8, %v77_v60, %v109_v5  ;;  %v81_v13 = vadd.f32 %v372_v7, %v60_v3 }
  0x15   :  { %v126_v12 = vsel %vm94_vm9, %v78_v61, %v110_v6  ;;  %v281_v14 = vunpack.c.l.bf16 %v329_v4  ;;  %vm96_vm11 = vcmp.ge.f32.partialorder %v80_v8, 0.0  ;;  %v112_v16 = vmul.f32 0.2, %v80_v8 }
  0x16   :  { %v306_v15 = vpack.c.bf16 %v126_v12, %v125_v11  ;;  %v127_v17 = vsel %vm95_vm10, %v79_v2, %v111_v9  ;;  %v82_v18 = vadd.f32 %v372_v7, %v61_v10  ;;  %vm97_vm12 = vcmp.ge.f32.partialorder %v81_v13, 0.0 }
  0x17   :  { %v113_v19 = vmul.f32 0.2, %v81_v13  ;;  %v282_v20 = vunpack.c.h.bf16 %v329_v4  ;;  %v128_v21 = vsel %vm96_vm11, %v80_v8, %v112_v16  ;;  %v62_v22 = vmul.f32 %v281_v14, %v358_v1 }
  0x18   :  { %333 = vst [vmem:[%s445_s2 + $0x20] sm:$0xff] %v306_v15   ;;  %v311_v23 = vpack.c.bf16 %v128_v21, %v127_v17  ;;  %vm98_vm13 = vcmp.ge.f32.partialorder %v82_v18, 0.0  ;;  %v114_v24 = vmul.f32 0.2, %v82_v18 }
  0x19   :  { %v129_v25 = vsel %vm97_vm12, %v81_v13, %v113_v19  ;;  %v63_v26 = vmul.f32 %v282_v20, %v358_v1  ;;  %v83_v27 = vadd.f32 %v372_v7, %v62_v22 }
  0x1a   :  { %334 = vst [vmem:[%s445_s2 + $0x28] sm:$0xff] %v311_v23   ;;  %v130_v28 = vsel %vm98_vm13, %v82_v18, %v114_v24 }
  0x1b   :  { %v316_v29 = vpack.c.bf16 %v130_v28, %v129_v25  ;;  %v84_v30 = vadd.f32 %v372_v7, %v63_v26  ;;  %vm99_vm14 = vcmp.ge.f32.partialorder %v83_v27, 0.0  ;;  %v115_v31 = vmul.f32 0.2, %v83_v27 }
  0x1d   :  { %335 = vst [vmem:[%s445_s2 + $0x30] sm:$0xff] %v316_v29   ;;  %vm100_vm15 = vcmp.ge.f32.partialorder %v84_v30, 0.0  ;;  %v116_v32 = vmul.f32 0.2, %v84_v30  ;;  %v131_v33 = vsel %vm99_vm14, %v83_v27, %v115_v31 }
  0x1f   :  { %v132_v1 = vsel %vm100_vm15, %v84_v30, %v116_v32 }
  0x20   :  { %v321_v34 = vpack.c.bf16 %v132_v1, %v131_v33 }
  0x22   :  { %336 = vst [vmem:[%s445_s2 + $0x38] sm:$0xff] %v321_v34  }

// kernel: d_forward.10
= control target key start
LH: loop header
LB: loop body
LE: loop exit
PB: predicated region body
PF: predicated region fallthrough
CT: control target
= control target key end

     0   :  { %vm307_vm0 = vcmask 1040384   ;;  %s689_s1 = inlined_call_operand.vmem [shape: bf16[128,128], index: 1, kind: input, shape index: {}]   ;;  %s690_s0 = inlined_call_operand.vmem [shape: bf16[128,128], index: 0, kind: input, shape index: {}]   ;;  %s691_s2 = inlined_call_operand.vmem [shape: f32[1,128], index: 2, kind: input, shape index: {}]   ;;  %s692_s3 = inlined_call_operand.vmem [shape: bf16[128,128], index: 3, kind: output, shape index: {0}]   ;;  %s693_s4 = inlined_call_operand.vmem [shape: f32[1,2,128], index: 4, kind: output, shape index: {1}]  }
   0x1   :  { %v558_v0 = vld [vmem:[%s689_s1] sm:$0xff]   ;;  %v559_v1 = vld [vmem:[%s689_s1 + $0x8] sm:$0xff]   ;;  %v560_v2 = vld [vmem:[%s689_s1 + $0x10] sm:$0xff]  }
   0x2   :  { %510 = vmatprep.subr.bf16.mxu0 %v558_v0  ;;  %542 = vmatprep.subr.bf16.mxu1 %v558_v0  ;;  %v561_v3 = vld [vmem:[%s689_s1 + $0x18] sm:$0xff]   ;;  %v566_v4 = vld [vmem:[%s690_s0] sm:$0xff]   ;;  %v563_v7 = vld [vmem:[%s689_s1 + $0x28] sm:$0xff]  }
   0x3   :  { %511 = vmatpush3.bf16.msra.mxu0 %v558_v0  ;;  %550 = vmatpush3.bf16.msra.mxu1 %v558_v0  ;;  %v562_v5 = vld [vmem:[%s689_s1 + $0x20] sm:$0xff]   ;;  %v564_v8 = vld [vmem:[%s689_s1 + $0x30] sm:$0xff]   ;;  %v565_v9 = vld [vmem:[%s689_s1 + $0x38] sm:$0xff]  }
   0x4   :  { %512 = vmatprep.subr.bf16.mxu0 %v559_v1  ;;  %543 = vmatprep.subr.bf16.mxu1 %v559_v1  ;;  %v570_v6 = vld [vmem:[%s690_s0 + $0x20] sm:$0xff]   ;;  %v567_v10 = vld [vmem:[%s690_s0 + $0x8] sm:$0xff]   ;;  %v568_v12 = vld [vmem:[%s690_s0 + $0x10] sm:$0xff]  }
   0x5   :  { %526 = vmatprep.mubr.bf16.mxu0 %v566_v4  ;;  %534 = vmatprep.mubr.bf16.mxu1 %v570_v6  ;;  %v571_v11 = vld [vmem:[%s690_s0 + $0x28] sm:$0xff]   ;;  %v572_v13 = vld [vmem:[%s690_s0 + $0x30] sm:$0xff]   ;;  %v569_v14 = vld [vmem:[%s690_s0 + $0x18] sm:$0xff]  }
   0x6   :  { %v573_v15 = vld [vmem:[%s690_s0 + $0x38] sm:$0xff]   ;;  %v398_v16 = vld [vmem:[%s691_s2] ss:$0 sm:$0xff] }
   0x7   :  { %513 = vmatpush3.bf16.msra.mxu0 %v559_v1  ;;  %551 = vmatpush3.bf16.msra.mxu1 %v559_v1 }
   0x8   :  { %514 = vmatprep.subr.bf16.mxu0 %v560_v2  ;;  %544 = vmatprep.subr.bf16.mxu1 %v560_v2 }
   0xb   :  { %515 = vmatpush3.bf16.msra.mxu0 %v560_v2  ;;  %552 = vmatpush3.bf16.msra.mxu1 %v560_v2 }
   0xc   :  { %516 = vmatprep.subr.bf16.mxu0 %v561_v3  ;;  %545 = vmatprep.subr.bf16.mxu1 %v561_v3 }
   0xf   :  { %517 = vmatpush3.bf16.msra.mxu0 %v561_v3  ;;  %553 = vmatpush3.bf16.msra.mxu1 %v561_v3 }
  0x10   :  { %518 = vmatprep.subr.bf16.mxu0 %v562_v5  ;;  %546 = vmatprep.subr.bf16.mxu1 %v562_v5 }
  0x13   :  { %519 = vmatpush3.bf16.msra.mxu0 %v562_v5  ;;  %554 = vmatpush3.bf16.msra.mxu1 %v562_v5 }
  0x14   :  { %520 = vmatprep.subr.bf16.mxu0 %v563_v7  ;;  %547 = vmatprep.subr.bf16.mxu1 %v563_v7 }
  0x17   :  { %521 = vmatpush3.bf16.msra.mxu0 %v563_v7  ;;  %555 = vmatpush3.bf16.msra.mxu1 %v563_v7 }
  0x18   :  { %522 = vmatprep.subr.bf16.mxu0 %v564_v8  ;;  %548 = vmatprep.subr.bf16.mxu1 %v564_v8 }
  0x1b   :  { %523 = vmatpush3.bf16.msra.mxu0 %v564_v8  ;;  %556 = vmatpush3.bf16.msra.mxu1 %v564_v8 }
  0x1c   :  { %524 = vmatprep.subr.bf16.mxu0 %v565_v9  ;;  %549 = vmatprep.subr.bf16.mxu1 %v565_v9 }
  0x1f   :  { %525 = vmatpush3.bf16.msra.mxu0 %v565_v9  ;;  %557 = vmatpush3.bf16.msra.mxu1 %v565_v9 }
  0x22   :  { %527 = vmatmul.mubr.bf16.vlgmr.msra.gmra.mrb[0].mxu0 %v567_v10  ;;  %535 = vmatmul.mubr.bf16.vlgmr.msra.gmra.mrb[0].mxu1 %v571_v11 }
  0x23   :  { %530 = vmatprep.mubr.bf16.mxu0 %v568_v12  ;;  %538 = vmatprep.mubr.bf16.mxu1 %v572_v13 }
  0x2a   :  { %531 = vmatmul.mubr.bf16.gmra.mrb[4].mxu0 %v569_v14  ;;  %539 = vmatmul.mubr.bf16.gmra.mrb[4].mxu1 %v573_v15 }
  0xf5   :  { %v528_v17 = vpop.f32.mrb[0].mxu0  ;;  %v536_v18 = vpop.f32.mrb[0].mxu1 }
  0xf6   :  { %v186_v19 = vpop.f32.mrb[1].mxu0  ;;  %v650_v20 = vadd.f32 %v536_v18, %v398_v16  ;;  %v218_v21 = vpop.f32.mrb[1].mxu1  ;;  %v195_v25 = vadd.f32 %v528_v17, %v398_v16 }
  0xf7   :  { %v187_v22 = vadd.f32 %v398_v16, %v186_v19  ;;  %v529_v23 = vpop.f32.mrb[2].mxu0  ;;  %v537_v24 = vpop.f32.mrb[2].mxu1  ;;  %v219_v28 = vadd.f32 %v398_v16, %v218_v21 }
  0xf8   :  { %v198_v26 = vadd.f32 %v529_v23, %v398_v16  ;;  %v189_v27 = vpop.f32.mrb[3].mxu0  ;;  %v652_v29 = vadd.f32 %v537_v24, %v398_v16  ;;  %v221_v30 = vpop.f32.mrb[3].mxu1  ;;  %v272_v40 = vmul.f32 %v195_v25, %v195_v25  ;;  %v280_v21 = vmul.f32 %v650_v20, %v650_v20 }
  0xf9   :  { %v190_v31 = vadd.f32 %v398_v16, %v189_v27  ;;  %v222_v32 = vadd.f32 %v398_v16, %v221_v30  ;;  %v270_v35 = vmul.f32 %v187_v22, %v187_v22  ;;  %v278_v14 = vmul.f32 %v219_v28, %v219_v28 }
  0xfa   :  { %v455_v33 = vpack.c.bf16 %v198_v26, %v195_v25  ;;  %v475_v34 = vpack.c.bf16 %v652_v29, %v650_v20  ;;  %v273_v47 = vmul.f32 %v198_v26, %v198_v26  ;;  %v281_v24 = vmul.f32 %v652_v29, %v652_v29 }
  0xfb   :  { %v249_v36 = vadd.f32 %v190_v31, %v187_v22  ;;  %v271_v37 = vmul.f32 %v190_v31, %v190_v31  ;;  %v450_v38 = vpack.c.bf16 %v190_v31, %v187_v22  ;;  %v470_v39 = vpack.c.bf16 %v222_v32, %v219_v28 }
  0xfc   :  { %487 = vst [vmem:[%s692_s3 + $0x8] sm:$0xff] %v455_v33   ;;  %491 = vst [vmem:[%s692_s3 + $0x28] sm:$0xff] %v475_v34   ;;  %v279_v19 = vmul.f32 %v222_v32, %v222_v32 }
  0xfd   :  { %v250_v41 = vadd.f32 %v249_v36, %v195_v25  ;;  %v286_v42 = vadd.f32 %v271_v37, %v270_v35  ;;  %451 = vst [vmem:[%s692_s3] sm:$0xff] %v450_v38   ;;  %v532_v43 = vpop.f32.mrb[4].mxu0  ;;  %v540_v44 = vpop.f32.mrb[4].mxu1  ;;  %490 = vst [vmem:[%s692_s3 + $0x20] sm:$0xff] %v470_v39  }
  0xfe   :  { %v202_v45 = vpop.f32.mrb[5].mxu0  ;;  %v234_v46 = vpop.f32.mrb[5].mxu1  ;;  %v211_v53 = vadd.f32 %v532_v43, %v398_v16  ;;  %v243_v56 = vadd.f32 %v540_v44, %v398_v16 }
  0xff   :  { %v287_v48 = vadd.f32 %v286_v42, %v272_v40  ;;  %v203_v49 = vadd.f32 %v398_v16, %v202_v45  ;;  %v251_v50 = vadd.f32 %v250_v41, %v198_v26  ;;  %v533_v51 = vpop.f32.mrb[6].mxu0  ;;  %v541_v52 = vpop.f32.mrb[6].mxu1  ;;  %v235_v0 = vadd.f32 %v398_v16, %v234_v46 }
 0x100   :  { %v214_v54 = vadd.f32 %v533_v51, %v398_v16  ;;  %v205_v55 = vpop.f32.mrb[7].mxu0  ;;  %v246_v57 = vadd.f32 %v541_v52, %v398_v16  ;;  %v237_v58 = vpop.f32.mrb[7].mxu1  ;;  %v276_v7 = vmul.f32 %v211_v53, %v211_v53  ;;  %v284_v35 = vmul.f32 %v243_v56, %v243_v56 }
 0x101   :  { %v252_v59 = vadd.f32 %v251_v50, %v203_v49  ;;  %v274_v60 = vmul.f32 %v203_v49, %v203_v49  ;;  %v288_v61 = vadd.f32 %v287_v48, %v273_v47  ;;  %v206_v62 = vadd.f32 %v398_v16, %v205_v55 }
 0x102   :  { %v465_v63 = vpack.c.bf16 %v214_v54, %v211_v53  ;;  %v485_v5 = vpack.c.bf16 %v246_v57, %v243_v56  ;;  %v238_v6 = vadd.f32 %v398_v16, %v237_v58  ;;  %v277_v11 = vmul.f32 %v214_v54, %v214_v54 }
 0x103   :  { %v289_v1 = vadd.f32 %v288_v61, %v274_v60  ;;  %v253_v2 = vadd.f32 %v252_v59, %v206_v62  ;;  %v275_v3 = vmul.f32 %v206_v62, %v206_v62  ;;  %v460_v4 = vpack.c.bf16 %v206_v62, %v203_v49 }
 0x104   :  { %489 = vst [vmem:[%s692_s3 + $0x18] sm:$0xff] %v465_v63   ;;  %493 = vst [vmem:[%s692_s3 + $0x38] sm:$0xff] %v485_v5   ;;  %v480_v10 = vpack.c.bf16 %v238_v6, %v235_v0  ;;  %v282_v27 = vmul.f32 %v235_v0, %v235_v0  ;;  %v283_v34 = vmul.f32 %v238_v6, %v238_v6 }
 0x105   :  { %v254_v8 = vadd.f32 %v253_v2, %v211_v53  ;;  %v290_v9 = vadd.f32 %v289_v1, %v275_v3  ;;  %488 = vst [vmem:[%s692_s3 + $0x10] sm:$0xff] %v460_v4   ;;  %v285_v37 = vmul.f32 %v246_v57, %v246_v57 }
 0x106   :  { %492 = vst [vmem:[%s692_s3 + $0x30] sm:$0xff] %v480_v10  }
 0x107   :  { %v291_v12 = vadd.f32 %v290_v9, %v276_v7  ;;  %v255_v13 = vadd.f32 %v254_v8, %v214_v54 }
 0x109   :  { %v256_v15 = vadd.f32 %v255_v13, %v219_v28  ;;  %v292_v16 = vadd.f32 %v291_v12, %v277_v11 }
 0x10b   :  { %v293_v17 = vadd.f32 %v292_v16, %v278_v14  ;;  %v257_v18 = vadd.f32 %v256_v15, %v222_v32 }
 0x10d   :  { %v258_v22 = vadd.f32 %v257_v18, %v650_v20  ;;  %v294_v23 = vadd.f32 %v293_v17, %v279_v19 }
 0x10f   :  { %v295_v25 = vadd.f32 %v294_v23, %v280_v21  ;;  %v259_v26 = vadd.f32 %v258_v22, %v652_v29 }
 0x111   :  { %v260_v30 = vadd.f32 %v259_v26, %v235_v0  ;;  %v296_v31 = vadd.f32 %v295_v25, %v281_v24 }
 0x113   :  { %v297_v28 = vadd.f32 %v296_v31, %v282_v27  ;;  %v261_v33 = vadd.f32 %v260_v30, %v238_v6 }
 0x115   :  { %v262_v32 = vadd.f32 %v261_v33, %v243_v56  ;;  %v298_v36 = vadd.f32 %v297_v28, %v283_v34 }
 0x117   :  { %v263_v38 = vadd.f32 %v262_v32, %v246_v57  ;;  %v299_v39 = vadd.f32 %v298_v36, %v284_v35 }
 0x119   :  { %v264_v20 = vrot.slane %v263_v38, 4  ;;  %v300_v40 = vadd.f32 %v299_v39, %v285_v37 }
 0x11b   :  { %v265_v41 = vadd.f32 %v264_v20, %v263_v38  ;;  %v301_v42 = vrot.slane %v300_v40, 4 }
 0x11d   :  { %v266_v43 = vrot.slane %v265_v41, 2  ;;  %v302_v44 = vadd.f32 %v301_v42, %v300_v40 }
 0x11f   :  { %v267_v45 = vadd.f32 %v266_v43, %v265_v41  ;;  %v303_v29 = vrot.slane %v302_v44, 2 }
 0x121   :  { %v268_v46 = vrot.slane %v267_v45, 1  ;;  %v304_v47 = vadd.f32 %v303_v29, %v302_v44 }
 0x123   :  { %v305_v48 = vrot.slane %v304_v47, 1  ;;  %v269_v49 = vadd.f32 %v268_v46, %v267_v45 }
 0x125   :  { %v306_v50 = vadd.f32 %v305_v48, %v304_v47 }
 0x127   :  { %v308_v51 = vsel %vm307_vm0, %v269_v49, %v306_v50 }
 0x128   :  { %309 = vst [vmem:[%s693_s4] sm:$0x3] %v308_v51 }

// kernel: d_forward.12
= control target key start
LH: loop header
LB: loop body
LE: loop exit
PB: predicated region body
PF: predicated region fallthrough
CT: control target
= control target key end

     0   :  { %vm175_vm0 = vcmask 1040384   ;;  %s343_s1 = inlined_call_operand.vmem [shape: bf16[128,128], index: 1, kind: input, shape index: {}]   ;;  %s344_s0 = inlined_call_operand.vmem [shape: bf16[32,128], index: 0, kind: input, shape index: {}]   ;;  %s345_s2 = inlined_call_operand.vmem [shape: f32[1,128], index: 2, kind: input, shape index: {}]   ;;  %s346_s3 = inlined_call_operand.vmem [shape: bf16[32,128], index: 3, kind: output, shape index: {0}]   ;;  %s347_s4 = inlined_call_operand.vmem [shape: f32[1,2,128], index: 4, kind: output, shape index: {1}]  }
   0x1   :  { %v266_v0 = vld [vmem:[%s343_s1] sm:$0xff]   ;;  %v267_v1 = vld [vmem:[%s343_s1 + $0x8] sm:$0xff]   ;;  %v268_v2 = vld [vmem:[%s343_s1 + $0x10] sm:$0xff]  }
   0x2   :  { %246 = vmatprep.subr.bf16.mxu0 %v266_v0  ;;  %v269_v3 = vld [vmem:[%s343_s1 + $0x18] sm:$0xff]   ;;  %v274_v4 = vld [vmem:[%s344_s0] sm:$0xff]   ;;  %v271_v6 = vld [vmem:[%s343_s1 + $0x28] sm:$0xff]  }
   0x3   :  { %247 = vmatpush3.bf16.msra.mxu0 %v266_v0  ;;  %262 = vmatprep.mubr.bf16.mxu0 %v274_v4  ;;  %v270_v5 = vld [vmem:[%s343_s1 + $0x20] sm:$0xff]   ;;  %v272_v7 = vld [vmem:[%s343_s1 + $0x30] sm:$0xff]   ;;  %v273_v8 = vld [vmem:[%s343_s1 + $0x38] sm:$0xff]  }
   0x4   :  { %248 = vmatprep.subr.bf16.mxu0 %v267_v1  ;;  %v275_v9 = vld [vmem:[%s344_s0 + $0x8] sm:$0xff]   ;;  %v206_v10 = vld [vmem:[%s345_s2] ss:$0 sm:$0xff] }
   0x7   :  { %249 = vmatpush3.bf16.msra.mxu0 %v267_v1 }
   0x8   :  { %250 = vmatprep.subr.bf16.mxu0 %v268_v2 }
   0xb   :  { %251 = vmatpush3.bf16.msra.mxu0 %v268_v2 }
   0xc   :  { %252 = vmatprep.subr.bf16.mxu0 %v269_v3 }
   0xf   :  { %253 = vmatpush3.bf16.msra.mxu0 %v269_v3 }
  0x10   :  { %254 = vmatprep.subr.bf16.mxu0 %v270_v5 }
  0x13   :  { %255 = vmatpush3.bf16.msra.mxu0 %v270_v5 }
  0x14   :  { %256 = vmatprep.subr.bf16.mxu0 %v271_v6 }
  0x17   :  { %257 = vmatpush3.bf16.msra.mxu0 %v271_v6 }
  0x18   :  { %258 = vmatprep.subr.bf16.mxu0 %v272_v7 }
  0x1b   :  { %259 = vmatpush3.bf16.msra.mxu0 %v272_v7 }
  0x1c   :  { %260 = vmatprep.subr.bf16.mxu0 %v273_v8 }
  0x1f   :  { %261 = vmatpush3.bf16.msra.mxu0 %v273_v8 }
  0x22   :  { %263 = vmatmul.mubr.bf16.vlgmr.msra.gmra.mrb[0].mxu0 %v275_v9 }
  0xf5   :  { %v264_v11 = vpop.f32.mrb[0].mxu0 }
  0xf6   :  { %v138_v12 = vpop.f32.mrb[1].mxu0  ;;  %v147_v15 = vadd.f32 %v264_v11, %v206_v10 }
  0xf7   :  { %v139_v13 = vadd.f32 %v206_v10, %v138_v12  ;;  %v265_v14 = vpop.f32.mrb[2].mxu0 }
  0xf8   :  { %v150_v16 = vadd.f32 %v265_v14, %v206_v10  ;;  %v141_v17 = vpop.f32.mrb[3].mxu0  ;;  %v164_v24 = vmul.f32 %v147_v15, %v147_v15 }
  0xf9   :  { %v142_v18 = vadd.f32 %v206_v10, %v141_v17  ;;  %v162_v20 = vmul.f32 %v139_v13, %v139_v13 }
  0xfa   :  { %v233_v19 = vpack.c.bf16 %v150_v16, %v147_v15  ;;  %v165_v27 = vmul.f32 %v150_v16, %v150_v16 }
  0xfb   :  { %v153_v21 = vadd.f32 %v142_v18, %v139_v13  ;;  %v163_v22 = vmul.f32 %v142_v18, %v142_v18  ;;  %v228_v23 = vpack.c.bf16 %v142_v18, %v139_v13 }
  0xfc   :  { %235 = vst [vmem:[%s346_s3 + $0x8] sm:$0xff] %v233_v19  }
  0xfd   :  { %v154_v25 = vadd.f32 %v153_v21, %v147_v15  ;;  %v166_v26 = vadd.f32 %v163_v22, %v162_v20  ;;  %229 = vst [vmem:[%s346_s3] sm:$0xff] %v228_v23  }
  0xff   :  { %v155_v28 = vadd.f32 %v154_v25, %v150_v16  ;;  %v167_v29 = vadd.f32 %v166_v26, %v164_v24 }
 0x101   :  { %v156_v30 = vrot.slane %v155_v28, 4  ;;  %v168_v31 = vadd.f32 %v167_v29, %v165_v27 }
 0x103   :  { %v157_v32 = vadd.f32 %v156_v30, %v155_v28  ;;  %v169_v33 = vrot.slane %v168_v31, 4 }
 0x105   :  { %v158_v34 = vrot.slane %v157_v32, 2  ;;  %v170_v35 = vadd.f32 %v169_v33, %v168_v31 }
 0x107   :  { %v159_v36 = vadd.f32 %v158_v34, %v157_v32  ;;  %v171_v37 = vrot.slane %v170_v35, 2 }
 0x109   :  { %v160_v38 = vrot.slane %v159_v36, 1  ;;  %v172_v39 = vadd.f32 %v171_v37, %v170_v35 }
 0x10b   :  { %v173_v40 = vrot.slane %v172_v39, 1  ;;  %v161_v41 = vadd.f32 %v160_v38, %v159_v36 }
 0x10d   :  { %v174_v42 = vadd.f32 %v173_v40, %v172_v39 }
 0x10f   :  { %v176_v43 = vsel %vm175_vm0, %v161_v41, %v174_v42 }
 0x110   :  { %177 = vst [vmem:[%s347_s4] sm:$0x3] %v176_v43 }

// kernel: d_forward.13
= control target key start
LH: loop header
LB: loop body
LE: loop exit
PB: predicated region body
PF: predicated region fallthrough
CT: control target
= control target key end

     0   :  { %s136_s0 = inlined_call_operand.vmem [shape: bf16[32,128], index: 0, kind: input, shape index: {}]   ;;  %s137_s1 = inlined_call_operand.vmem [shape: f32[2,128], index: 1, kind: input, shape index: {}]   ;;  %s138_s2 = inlined_call_operand.vmem [shape: bf16[32,128], index: 2, kind: output, shape index: {}]  }
   0x1   :  { %v84_v0 = vld [vmem:[%s136_s0] sm:$0xff]   ;;  %v101_v4 = vld [vmem:[%s136_s0 + $0x8] sm:$0xff]  }
   0x2   :  { %v73_v1 = vld [vmem:[%s137_s1] ss:$0 sm:$0xff]  ;;  %v85_v2 = vunpack.c.l.bf16 %v84_v0  ;;  %v86_v3 = vunpack.c.h.bf16 %v84_v0  ;;  %v74_v5 = vld [vmem:[%s137_s1 + $0x1] ss:$0 sm:$0xff]  ;;  %v89_v6 = vunpack.c.l.bf16 %v101_v4  ;;  %v90_v7 = vunpack.c.h.bf16 %v101_v4 }
   0x4   :  { %v24_v8 = vmul.f32 %v85_v2, %v73_v1  ;;  %v25_v9 = vmul.f32 %v86_v3, %v73_v1  ;;  %v26_v10 = vmul.f32 %v89_v6, %v73_v1  ;;  %v27_v11 = vmul.f32 %v90_v7, %v73_v1 }
   0x6   :  { %v33_v12 = vadd.f32 %v74_v5, %v24_v8  ;;  %v34_v13 = vadd.f32 %v74_v5, %v25_v9  ;;  %v35_v14 = vadd.f32 %v74_v5, %v26_v10  ;;  %v36_v15 = vadd.f32 %v74_v5, %v27_v11 }
   0x8   :  { %vm37_vm0 = vcmp.ge.f32.partialorder %v33_v12, 0.0  ;;  %vm38_vm1 = vcmp.ge.f32.partialorder %v34_v13, 0.0  ;;  %v41_v16 = vmul.f32 0.2, %v33_v12  ;;  %v42_v17 = vmul.f32 0.2, %v34_v13 }
   0x9   :  { %vm39_vm2 = vcmp.ge.f32.partialorder %v35_v14, 0.0  ;;  %vm40_vm3 = vcmp.ge.f32.partialorder %v36_v15, 0.0  ;;  %v43_v18 = vmul.f32 0.2, %v35_v14  ;;  %v44_v19 = vmul.f32 0.2, %v36_v15 }
   0xa   :  { %v45_v20 = vsel %vm37_vm0, %v33_v12, %v41_v16  ;;  %v46_v21 = vsel %vm38_vm1, %v34_v13, %v42_v17 }
   0xb   :  { %v94_v22 = vpack.c.bf16 %v46_v21, %v45_v20  ;;  %v47_v23 = vsel %vm39_vm2, %v35_v14, %v43_v18  ;;  %v48_v24 = vsel %vm40_vm3, %v36_v15, %v44_v19 }
   0xc   :  { %v99_v25 = vpack.c.bf16 %v48_v24, %v47_v23 }
   0xd   :  { %95 = vst [vmem:[%s138_s2] sm:$0xff] %v94_v22  }
   0xe   :  { %102 = vst [vmem:[%s138_s2 + $0x8] sm:$0xff] %v99_v25  }

// kernel: d_forward.14
= control target key start
LH: loop header
LB: loop body
LE: loop exit
PB: predicated region body
PF: predicated region fallthrough
CT: control target
= control target key end

     0   :  { %v226_v20 = vlaneseq  ;;  %v413_v32 = vmov 0.0   ;;  %vm274_vm1 = vcmask 1040384   ;;  %s511_s1 = inlined_call_operand.vmem [shape: bf16[256,128], index: 1, kind: input, shape index: {}]   ;;  %s512_s0 = inlined_call_operand.vmem [shape: bf16[32,256], index: 0, kind: input, shape index: {}]   ;;  %s513_s2 = inlined_call_operand.vmem [shape: f32[1,128], index: 2, kind: input, shape index: {}]   ;;  %s514_s3 = inlined_call_operand.vmem [shape: bf16[32,128], index: 3, kind: output, shape index: {0}]   ;;  %s515_s4 = inlined_call_operand.vmem [shape: f32[1,2,128], index: 4, kind: output, shape index: {1}]  }
   0x1   :  { %v391_v0 = vld [vmem:[%s511_s1 + $0x40] sm:$0xff]   ;;  %v393_v2 = vld [vmem:[%s511_s1 + $0x48] sm:$0xff]   ;;  %v395_v4 = vld [vmem:[%s511_s1 + $0x50] sm:$0xff]  }
   0x2   :  { %v392_v1 = vld [vmem:[%s511_s1] sm:$0xff]   ;;  %346 = vmatprep.subr.bf16.mxu0 %v391_v0  ;;  %374 = vmatprep.subr.bf16.mxu1 %v391_v0  ;;  %v394_v3 = vld [vmem:[%s511_s1 + $0x8] sm:$0xff]   ;;  %v396_v5 = vld [vmem:[%s511_s1 + $0x10] sm:$0xff]   ;;  %v227_v21 = vshrl.u32 %v226_v20, 7 }
   0x3   :  { %347 = vmatpush3.bf16.msra.mxu0 %v392_v1  ;;  %382 = vmatpush3.bf16.msra.mxu1 %v392_v1  ;;  %v397_v6 = vld [vmem:[%s511_s1 + $0x58] sm:$0xff]   ;;  %v399_v8 = vld [vmem:[%s511_s1 + $0x60] sm:$0xff]   ;;  %v401_v10 = vld [vmem:[%s511_s1 + $0x68] sm:$0xff]  }
   0x4   :  { %348 = vmatprep.subr.bf16.mxu0 %v393_v2  ;;  %375 = vmatprep.subr.bf16.mxu1 %v393_v2  ;;  %v398_v7 = vld [vmem:[%s511_s1 + $0x18] sm:$0xff]   ;;  %v400_v9 = vld [vmem:[%s511_s1 + $0x20] sm:$0xff]   ;;  %v402_v13 = vld [vmem:[%s511_s1 + $0x28] sm:$0xff]   ;;  %v229_v22 = vadd.s32 16, %v227_v21 }
   0x5   :  { %v409_v11 = vld [vmem:[%s512_s0 + $0x4] ss:$8 sps:$4 sm:$0xff]   ;;  %v412_v12 = vld [vmem:[%s512_s0 + $0x14] ss:$8 sps:$4 sm:$0xff]   ;;  %v407_v18 = vld [vmem:[%s512_s0] ss:$8 sps:$4 sm:$0xff]  }
   0x6   :  { %v403_v14 = vld [vmem:[%s511_s1 + $0x70] sm:$0xff]   ;;  %208 = vmatprep.mubr.bf16.mxu0 %v409_v11  ;;  %216 = vmatprep.mubr.bf16.mxu1 %v412_v12  ;;  %v405_v16 = vld [vmem:[%s511_s1 + $0x78] sm:$0xff]   ;;  %vm238_vm0 = vcmp.lt.s32.totalorder %v229_v22, 18  ;;  %v305_v25 = vld [vmem:[%s513_s2] ss:$0 sm:$0xff] }
   0x7   :  { %349 = vmatpush3.bf16.msra.mxu0 %v394_v3  ;;  %383 = vmatpush3.bf16.msra.mxu1 %v394_v3  ;;  %v404_v15 = vld [vmem:[%s511_s1 + $0x30] sm:$0xff]   ;;  %v406_v17 = vld [vmem:[%s511_s1 + $0x38] sm:$0xff]   ;;  %v326_v33 = vsel %vm238_vm0, 1.0, %v413_v32 }
   0x8   :  { %350 = vmatprep.subr.bf16.mxu0 %v395_v4  ;;  %376 = vmatprep.subr.bf16.mxu1 %v395_v4  ;;  %v410_v19 = vld [vmem:[%s512_s0 + $0x10] ss:$8 sps:$4 sm:$0xff]  }
   0xb   :  { %351 = vmatpush3.bf16.msra.mxu0 %v396_v5  ;;  %384 = vmatpush3.bf16.msra.mxu1 %v396_v5 }
   0xc   :  { %352 = vmatprep.subr.bf16.mxu0 %v397_v6  ;;  %377 = vmatprep.subr.bf16.mxu1 %v397_v6 }
   0xf   :  { %353 = vmatpush3.bf16.msra.mxu0 %v398_v7  ;;  %385 = vmatpush3.bf16.msra.mxu1 %v398_v7 }
  0x10   :  { %354 = vmatprep.subr.bf16.mxu0 %v399_v8  ;;  %378 = vmatprep.subr.bf16.mxu1 %v399_v8 }
  0x13   :  { %355 = vmatpush3.bf16.msra.mxu0 %v400_v9  ;;  %386 = vmatpush3.bf16.msra.mxu1 %v400_v9 }
  0x14   :  { %356 = vmatprep.subr.bf16.mxu0 %v401_v10  ;;  %379 = vmatprep.subr.bf16.mxu1 %v401_v10 }
  0x17   :  { %357 = vmatpush3.bf16.msra.mxu0 %v402_v13  ;;  %387 = vmatpush3.bf16.msra.mxu1 %v402_v13 }
  0x18   :  { %358 = vmatprep.subr.bf16.mxu0 %v403_v14  ;;  %380 = vmatprep.subr.bf16.mxu1 %v403_v14 }
  0x1b   :  { %359 = vmatpush3.bf16.msra.mxu0 %v404_v15  ;;  %388 = vmatpush3.bf16.msra.mxu1 %v404_v15 }
  0x1c   :  { %360 = vmatprep.subr.bf16.mxu0 %v405_v16  ;;  %381 = vmatprep.subr.bf16.mxu1 %v405_v16 }
  0x1f   :  { %361 = vmatpush3.bf16.msra.mxu0 %v406_v17  ;;  %389 = vmatpush3.bf16.msra.mxu1 %v406_v17 }
  0x22   :  { %209 = vmatmul.mubr.bf16.vlgmr.msra.gmra.mrb[0].mxu0 %v407_v18  ;;  %217 = vmatmul.mubr.bf16.vlgmr.msra.gmra.mrb[0].mxu1 %v410_v19 }
  0xf5   :  { %v362_v23 = vpop.f32.mrb[0].mxu0  ;;  %v368_v24 = vpop.f32.mrb[0].mxu1 }
  0xf6   :  { %v363_v26 = vpop.f32.mrb[1].mxu0  ;;  %v369_v27 = vpop.f32.mrb[1].mxu1 }
  0xf7   :  { %v364_v28 = vadd.f32 %v363_v26, %v362_v23  ;;  %v370_v29 = vadd.f32 %v369_v27, %v368_v24  ;;  %v365_v30 = vpop.f32.mrb[2].mxu0  ;;  %v371_v31 = vpop.f32.mrb[2].mxu1 }
  0xf8   :  { %v366_v34 = vpop.f32.mrb[3].mxu0  ;;  %v372_v35 = vpop.f32.mrb[3].mxu1 }
  0xf9   :  { %v211_v36 = vadd.f32 %v364_v28, %v305_v25  ;;  %v219_v37 = vadd.f32 %v370_v29, %v305_v25  ;;  %v367_v38 = vadd.f32 %v366_v34, %v365_v30  ;;  %v373_v39 = vadd.f32 %v372_v35, %v371_v31 }
  0xfb   :  { %v250_v40 = vmul.f32 %v326_v33, %v219_v37  ;;  %v214_v41 = vadd.f32 %v367_v38, %v305_v25  ;;  %v222_v42 = vadd.f32 %v373_v39, %v305_v25  ;;  %v261_v43 = vmul.f32 %v211_v36, %v211_v36 }
  0xfd   :  { %v263_v44 = vmul.f32 %v250_v40, %v250_v40  ;;  %v252_v45 = vadd.f32 %v214_v41, %v211_v36  ;;  %v262_v46 = vmul.f32 %v214_v41, %v214_v41  ;;  %v338_v47 = vpack.c.bf16 %v214_v41, %v211_v36 }
  0xfe   :  { %v251_v48 = vmul.f32 0.0, %v222_v42  ;;  %v343_v49 = vpack.c.bf16 %v222_v42, %v219_v37 }
  0xff   :  { %v265_v50 = vadd.f32 %v262_v46, %v261_v43  ;;  %v253_v51 = vadd.f32 %v252_v45, %v250_v40  ;;  %339 = vst [vmem:[%s514_s3] sm:$0xff] %v338_v47  }
 0x100   :  { %345 = vst [vmem:[%s514_s3 + $0x8] sm:$0xff] %v343_v49   ;;  %v264_v53 = vmul.f32 %v251_v48, %v251_v48 }
 0x101   :  { %v254_v52 = vadd.f32 %v253_v51, %v251_v48  ;;  %v266_v54 = vadd.f32 %v265_v50, %v263_v44 }
 0x103   :  { %v255_v55 = vrot.slane %v254_v52, 4  ;;  %v267_v56 = vadd.f32 %v266_v54, %v264_v53 }
 0x105   :  { %v256_v57 = vadd.f32 %v255_v55, %v254_v52  ;;  %v268_v58 = vrot.slane %v267_v56, 4 }
 0x107   :  { %v257_v59 = vrot.slane %v256_v57, 2  ;;  %v269_v60 = vadd.f32 %v268_v58, %v267_v56 }
 0x109   :  { %v258_v61 = vadd.f32 %v257_v59, %v256_v57  ;;  %v270_v62 = vrot.slane %v269_v60, 2 }
 0x10b   :  { %v259_v63 = vrot.slane %v258_v61, 1  ;;  %v271_v0 = vadd.f32 %v270_v62, %v269_v60 }
 0x10d   :  { %v272_v1 = vrot.slane %v271_v0, 1  ;;  %v260_v2 = vadd.f32 %v259_v63, %v258_v61 }
 0x10f   :  { %v273_v3 = vadd.f32 %v272_v1, %v271_v0 }
 0x111   :  { %v275_v4 = vsel %vm274_vm1, %v260_v2, %v273_v3 }
 0x112   :  { %276 = vst [vmem:[%s515_s4] sm:$0x3] %v275_v4 }

// kernel: d_forward.17
= control target key start
LH: loop header
LB: loop body
LE: loop exit
PB: predicated region body
PF: predicated region fallthrough
CT: control target
= control target key end

     0   :  { %s91_s0 = inlined_call_operand.vmem [shape: bf16[16,128], index: 0, kind: input, shape index: {}]   ;;  %s92_s1 = inlined_call_operand.vmem [shape: f32[2,128], index: 1, kind: input, shape index: {}]   ;;  %s93_s2 = inlined_call_operand.vmem [shape: bf16[16,128], index: 2, kind: output, shape index: {}]  }
   0x1   :  { %v56_v0 = vld [vmem:[%s91_s0] sm:$0xff]  }
   0x2   :  { %v49_v1 = vld [vmem:[%s92_s1] ss:$0 sm:$0xff]  ;;  %v57_v2 = vunpack.c.l.bf16 %v56_v0  ;;  %v58_v3 = vunpack.c.h.bf16 %v56_v0  ;;  %v50_v4 = vld [vmem:[%s92_s1 + $0x1] ss:$0 sm:$0xff] }
   0x4   :  { %v20_v5 = vmul.f32 %v57_v2, %v49_v1  ;;  %v21_v6 = vmul.f32 %v58_v3, %v49_v1 }
   0x6   :  { %v27_v7 = vadd.f32 %v50_v4, %v20_v5  ;;  %v28_v8 = vadd.f32 %v50_v4, %v21_v6 }
   0x8   :  { %vm29_vm0 = vcmp.ge.f32.partialorder %v27_v7, 0.0  ;;  %vm30_vm1 = vcmp.ge.f32.partialorder %v28_v8, 0.0  ;;  %v31_v9 = vmul.f32 0.2, %v27_v7  ;;  %v32_v10 = vmul.f32 0.2, %v28_v8 }
   0xa   :  { %v33_v11 = vsel %vm29_vm0, %v27_v7, %v31_v9  ;;  %v34_v12 = vsel %vm30_vm1, %v28_v8, %v32_v10 }
   0xb   :  { %v62_v13 = vpack.c.bf16 %v34_v12, %v33_v11 }
   0xd   :  { %63 = vst [vmem:[%s93_s2] sm:$0xff] %v62_v13  }

// kernel: d_forward.16
= control target key start
LH: loop header
LB: loop body
LE: loop exit
PB: predicated region body
PF: predicated region fallthrough
CT: control target
= control target key end

     0   :  { %vm417_vm0 = vcmask 1040384   ;;  %s708_s1 = inlined_call_operand.vmem [shape: bf16[512,128], index: 1, kind: input, shape index: {}]   ;;  %s709_s0 = inlined_call_operand.vmem [shape: bf16[16,512], index: 0, kind: input, shape index: {}]   ;;  %s710_s2 = inlined_call_operand.vmem [shape: f32[1,128], index: 2, kind: input, shape index: {}]   ;;  %s711_s3 = inlined_call_operand.vmem [shape: bf16[16,128], index: 3, kind: output, shape index: {0}]   ;;  %s712_s4 = inlined_call_operand.vmem [shape: f32[1,2,128], index: 4, kind: output, shape index: {1}]  }
   0x1   :  { %v528_v0 = vld [vmem:[%s708_s1 + $0x40] sm:$0xff]   ;;  %v532_v4 = vld [vmem:[%s708_s1 + $0x48] sm:$0xff]   ;;  %v536_v8 = vld [vmem:[%s708_s1 + $0x50] sm:$0xff]  }
   0x2   :  { %v529_v1 = vld [vmem:[%s708_s1 + $0xc0] sm:$0xff]   ;;  %484 = vmatprep.subr.bf16.mxu0 %v528_v0  ;;  %v533_v5 = vld [vmem:[%s708_s1 + $0xc8] sm:$0xff]   ;;  %v537_v9 = vld [vmem:[%s708_s1 + $0xd0] sm:$0xff]  }
   0x3   :  { %v530_v2 = vld [vmem:[%s708_s1] sm:$0xff]   ;;  %506 = vmatprep.subr.bf16.mxu1 %v529_v1  ;;  %v534_v6 = vld [vmem:[%s708_s1 + $0x8] sm:$0xff]   ;;  %v538_v10 = vld [vmem:[%s708_s1 + $0x10] sm:$0xff]  }
   0x4   :  { %v531_v3 = vld [vmem:[%s708_s1 + $0x80] sm:$0xff]   ;;  %485 = vmatpush3.bf16.msra.mxu0 %v530_v2  ;;  %v535_v7 = vld [vmem:[%s708_s1 + $0x88] sm:$0xff]   ;;  %v539_v11 = vld [vmem:[%s708_s1 + $0x90] sm:$0xff]  }
   0x5   :  { %507 = vmatpush3.bf16.msra.mxu1 %v531_v3  ;;  %486 = vmatprep.subr.bf16.mxu0 %v532_v4  ;;  %v540_v12 = vld [vmem:[%s708_s1 + $0x58] sm:$0xff]   ;;  %v544_v16 = vld [vmem:[%s708_s1 + $0x60] sm:$0xff]   ;;  %v548_v20 = vld [vmem:[%s708_s1 + $0x68] sm:$0xff]  }
   0x6   :  { %508 = vmatprep.subr.bf16.mxu1 %v533_v5  ;;  %v541_v13 = vld [vmem:[%s708_s1 + $0xd8] sm:$0xff]   ;;  %v545_v17 = vld [vmem:[%s708_s1 + $0xe0] sm:$0xff]   ;;  %v549_v21 = vld [vmem:[%s708_s1 + $0xe8] sm:$0xff]  }
   0x7   :  { %v542_v14 = vld [vmem:[%s708_s1 + $0x18] sm:$0xff]   ;;  %v546_v18 = vld [vmem:[%s708_s1 + $0x20] sm:$0xff]   ;;  %v550_v22 = vld [vmem:[%s708_s1 + $0x28] sm:$0xff]  }
   0x8   :  { %487 = vmatpush3.bf16.msra.mxu0 %v534_v6  ;;  %v543_v15 = vld [vmem:[%s708_s1 + $0x98] sm:$0xff]   ;;  %v547_v19 = vld [vmem:[%s708_s1 + $0xa0] sm:$0xff]   ;;  %v551_v23 = vld [vmem:[%s708_s1 + $0xa8] sm:$0xff]  }
   0x9   :  { %509 = vmatpush3.bf16.msra.mxu1 %v535_v7  ;;  %488 = vmatprep.subr.bf16.mxu0 %v536_v8  ;;  %v552_v24 = vld [vmem:[%s708_s1 + $0x70] sm:$0xff]   ;;  %v556_v28 = vld [vmem:[%s708_s1 + $0x78] sm:$0xff]   ;;  %v438_v38 = vld [vmem:[%s710_s2] ss:$0 sm:$0xff] }
   0xa   :  { %510 = vmatprep.subr.bf16.mxu1 %v537_v9  ;;  %v553_v25 = vld [vmem:[%s708_s1 + $0xf0] sm:$0xff]   ;;  %v557_v29 = vld [vmem:[%s708_s1 + $0xf8] sm:$0xff]  }
   0xb   :  { %v554_v26 = vld [vmem:[%s708_s1 + $0x30] sm:$0xff]   ;;  %v558_v30 = vld [vmem:[%s708_s1 + $0x38] sm:$0xff]  }
   0xc   :  { %489 = vmatpush3.bf16.msra.mxu0 %v538_v10  ;;  %v555_v27 = vld [vmem:[%s708_s1 + $0xb0] sm:$0xff]   ;;  %v559_v31 = vld [vmem:[%s708_s1 + $0xb8] sm:$0xff]  }
   0xd   :  { %511 = vmatpush3.bf16.msra.mxu1 %v539_v11  ;;  %490 = vmatprep.subr.bf16.mxu0 %v540_v12  ;;  %v560_v32 = vld [vmem:[%s709_s0] ss:$16 sps:$4 sm:$0xff]   ;;  %v562_v33 = vld [vmem:[%s709_s0 + $0x4] ss:$16 sps:$4 sm:$0xff]   ;;  %v563_v34 = vld [vmem:[%s709_s0 + $0x8] ss:$16 sps:$4 sm:$0xff]  }
   0xe   :  { %512 = vmatprep.subr.bf16.mxu1 %v541_v13  ;;  %v565_v35 = vld [vmem:[%s709_s0 + $0xc] ss:$16 sps:$4 sm:$0xff]   ;;  %336 = vmatprep.mubr.bf16.mxu0 %v562_v33 }
   0xf   :  { %377 = vmatprep.mubr.bf16.mxu1 %v565_v35 }
  0x10   :  { %491 = vmatpush3.bf16.msra.mxu0 %v542_v14 }
  0x11   :  { %513 = vmatpush3.bf16.msra.mxu1 %v543_v15  ;;  %492 = vmatprep.subr.bf16.mxu0 %v544_v16 }
  0x12   :  { %514 = vmatprep.subr.bf16.mxu1 %v545_v17 }
  0x14   :  { %493 = vmatpush3.bf16.msra.mxu0 %v546_v18 }
  0x15   :  { %515 = vmatpush3.bf16.msra.mxu1 %v547_v19  ;;  %494 = vmatprep.subr.bf16.mxu0 %v548_v20 }
  0x16   :  { %516 = vmatprep.subr.bf16.mxu1 %v549_v21 }
  0x18   :  { %495 = vmatpush3.bf16.msra.mxu0 %v550_v22 }
  0x19   :  { %517 = vmatpush3.bf16.msra.mxu1 %v551_v23  ;;  %496 = vmatprep.subr.bf16.mxu0 %v552_v24 }
  0x1a   :  { %518 = vmatprep.subr.bf16.mxu1 %v553_v25 }
  0x1c   :  { %497 = vmatpush3.bf16.msra.mxu0 %v554_v26 }
  0x1d   :  { %519 = vmatpush3.bf16.msra.mxu1 %v555_v27  ;;  %498 = vmatprep.subr.bf16.mxu0 %v556_v28 }
  0x1e   :  { %520 = vmatprep.subr.bf16.mxu1 %v557_v29 }
  0x20   :  { %499 = vmatpush3.bf16.msra.mxu0 %v558_v30 }
  0x21   :  { %521 = vmatpush3.bf16.msra.mxu1 %v559_v31 }
  0x23   :  { %337 = vmatmul.mubr.bf16.vlgmr.msra.gmra.mrb[0].mxu0 %v560_v32 }
  0x24   :  { %378 = vmatmul.mubr.bf16.vlgmr.msra.gmra.mrb[0].mxu1 %v563_v34 }
  0xf6   :  { %v500_v36 = vpop.f32.mrb[0].mxu0 }
  0xf7   :  { %v522_v37 = vpop.f32.mrb[0].mxu1  ;;  %v501_v39 = vpop.f32.mrb[1].mxu0 }
  0xf8   :  { %v502_v40 = vadd.f32 %v501_v39, %v500_v36  ;;  %v523_v41 = vpop.f32.mrb[1].mxu1  ;;  %v503_v42 = vpop.f32.mrb[2].mxu0 }
  0xf9   :  { %v524_v43 = vadd.f32 %v523_v41, %v522_v37  ;;  %v525_v44 = vpop.f32.mrb[2].mxu1  ;;  %v504_v45 = vpop.f32.mrb[3].mxu0 }
  0xfa   :  { %v339_v46 = vadd.f32 %v502_v40, %v438_v38  ;;  %v505_v47 = vadd.f32 %v504_v45, %v503_v42  ;;  %v526_v48 = vpop.f32.mrb[3].mxu1 }
  0xfb   :  { %v527_v49 = vadd.f32 %v526_v48, %v525_v44 }
  0xfc   :  { %v380_v50 = vadd.f32 %v524_v43, %v339_v46  ;;  %v342_v51 = vadd.f32 %v505_v47, %v438_v38 }
  0xfe   :  { %v383_v52 = vadd.f32 %v527_v49, %v342_v51  ;;  %v408_v55 = vmul.f32 %v380_v50, %v380_v50 }
 0x100   :  { %v400_v53 = vmul.f32 0.0, %v383_v52  ;;  %v482_v54 = vpack.c.bf16 %v383_v52, %v380_v50 }
 0x102   :  { %v401_v56 = vadd.f32 %v400_v53, %v380_v50  ;;  %v409_v57 = vmul.f32 %v400_v53, %v400_v53  ;;  %483 = vst [vmem:[%s711_s3] sm:$0xff] %v482_v54  }
 0x104   :  { %v402_v58 = vrot.slane %v401_v56, 4  ;;  %v410_v59 = vadd.f32 %v409_v57, %v408_v55 }
 0x106   :  { %v403_v60 = vadd.f32 %v402_v58, %v401_v56  ;;  %v411_v61 = vrot.slane %v410_v59, 4 }
 0x108   :  { %v404_v62 = vrot.slane %v403_v60, 2  ;;  %v412_v63 = vadd.f32 %v411_v61, %v410_v59 }
 0x10a   :  { %v405_v0 = vadd.f32 %v404_v62, %v403_v60  ;;  %v413_v1 = vrot.slane %v412_v63, 2 }
 0x10c   :  { %v406_v2 = vrot.slane %v405_v0, 1  ;;  %v414_v3 = vadd.f32 %v413_v1, %v412_v63 }
 0x10e   :  { %v415_v4 = vrot.slane %v414_v3, 1  ;;  %v407_v5 = vadd.f32 %v406_v2, %v405_v0 }
 0x110   :  { %v416_v6 = vadd.f32 %v415_v4, %v414_v3 }
 0x112   :  { %v418_v7 = vsel %vm417_vm0, %v407_v5, %v416_v6 }
 0x113   :  { %419 = vst [vmem:[%s712_s4] sm:$0x3] %v418_v7 }

</bundles_post_ra>
